<compile_context>
chip_gen: v7x
topology: tpu7x:2x2x1
jax: 0.10.0
libtpu: 0.0.40
codegen_flags: <defaults>
</compile_context>

<pallas_src>
import functools

import jax
import jax.numpy as jnp
from jax.experimental import pallas as pl
from jax.experimental.pallas import tpu as pltpu

EPS = 1e-5  # nn.LayerNorm default


def _erf(x):
    # Abramowitz & Stegun 7.1.26 polynomial (|err| < 1.5e-7) so the exact GELU matches
    # PyTorch nn.GELU() without requiring an erf lowering. exp() lands on the EUP.
    a1, a2, a3, a4, a5 = 0.254829592, -0.284496736, 1.421413741, -1.453152027, 1.061405429
    p = 0.3275911
    s = jnp.where(x >= 0.0, 1.0, -1.0)
    ax = jnp.abs(x)
    t = 1.0 / (1.0 + p * ax)
    poly = ((((a5 * t + a4) * t + a3) * t + a2) * t + a1) * t
    return s * (1.0 - poly * jnp.exp(-ax * ax))


def _gelu_exact(x):
    # TODO(synk): on v6e/v7x this elementwise path could run in bf16 (bf16 VPU); kept f32
    # for v5e compatibility and accuracy.
    return 0.5 * x * (1.0 + _erf(x * 0.7071067811865476))


def _layernorm(x, w2d, b2d):
    mu = jnp.mean(x, axis=-1, keepdims=True)
    var = jnp.mean((x - mu) ** 2, axis=-1, keepdims=True)
    return (x - mu) * jax.lax.rsqrt(var + EPS) * w2d + b2d


def fused_kernel(q_ref, k_ref,
                 n1w_ref, n1b_ref, n2w_ref, n2b_ref, n3w_ref, n3b_ref,
                 wq_ref, wkv_ref, wp_ref, pb_ref, fc1_ref, fc2_ref,
                 o_ref, *, num_heads):
    d = pl.program_id(1)

    # Depth step 0: seed the resident output block with the (pos-embedded) query.
    @pl.when(d == 0)
    def _():
        o_ref[...] = q_ref[...]

    x = o_ref[0].astype(jnp.float32)       # (Nq, C) residual stream, resident across depth
    kin = k_ref[0].astype(jnp.float32)     # (Nk, C), bf16 in HBM/VMEM -> f32 for the LN
    Nq, C = x.shape
    Nk = kin.shape[0]
    H = num_heads
    D = C // H

    # --- pre-norms (f32), bf16 operands for the MXU ---
    qn = _layernorm(x, n1w_ref[0], n1b_ref[0]).astype(jnp.bfloat16)     # (Nq, C)
    kn = _layernorm(kin, n2w_ref[0], n2b_ref[0]).astype(jnp.bfloat16)   # (Nk, C)

    # --- fused full-width projections: Q = (Nq,C)x(C,C), KV = (Nk,C)x(C,2C) ---
    # wq is pre-scaled by 1/sqrt(D) in the wrapper; f32 accumulation on the MXU.
    qp = jnp.dot(qn, wq_ref[0], preferred_element_type=jnp.float32).astype(jnp.bfloat16)
    kv = jnp.dot(kn, wkv_ref[0], preferred_element_type=jnp.float32).astype(jnp.bfloat16)
    kp = kv[:, :C]          # lane-aligned split of the fused K/V result
    vp = kv[:, C:]

    # --- multi-head scaled-dot-product cross attention (dropout p = 0) ---
    # Per-head matmuls (contraction / width = D) are inherent to MHA; the lane slices
    # below are static and D-aligned. Heads are concatenated back to a lane-dense
    # (Nq, C) so the output projection is a single full-width (C, C) matmul.
    # TODO(synk): for very long Nk stream K/V tiles with an online softmax instead of
    # materializing the (Nq, Nk) scores per head (only matters on v7x 64 MiB VMEM).
    ctx_parts = []
    for h in range(H):                      # static unroll, H small
        qh = qp[:, h * D:(h + 1) * D]       # (Nq, D) bf16
        kh = kp[:, h * D:(h + 1) * D]       # (Nk, D) bf16
        vh = vp[:, h * D:(h + 1) * D]       # (Nk, D) bf16
        s = jax.lax.dot_general(qh, kh, (((1,), (1,)), ((), ())),
                                preferred_element_type=jnp.float32)     # (Nq, Nk)
        s = s - jnp.max(s, axis=-1, keepdims=True)
        p = jnp.exp(s)
        p = p * pl.reciprocal(jnp.sum(p, axis=-1, keepdims=True), approx=True)
        ctx_parts.append(jnp.dot(p.astype(jnp.bfloat16), vh,
                                 preferred_element_type=jnp.float32))   # (Nq, D)
    ctx = jnp.concatenate(ctx_parts, axis=-1).astype(jnp.bfloat16)      # (Nq, C)

    attn = jnp.dot(ctx, wp_ref[0], preferred_element_type=jnp.float32) + pb_ref[0]

    # --- first residual ---
    x = x + attn

    # --- norm3 + MLP (fc1 -> exact GELU -> fc2; biases off, dropout p = 0) ---
    xn = _layernorm(x, n3w_ref[0], n3b_ref[0]).astype(jnp.bfloat16)
    h1 = jnp.dot(xn, fc1_ref[0], preferred_element_type=jnp.float32)
    h1 = _gelu_exact(h1).astype(jnp.bfloat16)
    h2 = jnp.dot(h1, fc2_ref[0], preferred_element_type=jnp.float32)

    # --- second residual; block stays resident in VMEM until the batch index changes ---
    o_ref[0] = (x + h2).astype(o_ref.dtype)


def prepare_cross_transformer_params(params, num_heads):
    """One-time relayout / bf16 cast of per-block weights into depth-stacked slabs."""
    blocks = params["blocks"]
    C = params["pos_embed"].shape[-1]
    D = C // num_heads
    scale = float(D) ** -0.5
    bf16 = jnp.bfloat16
    stack = lambda name: jnp.stack([b[name] for b in blocks], axis=0)  # (depth, 1, C) f32
    return {
        "pos_embed": params["pos_embed"],
        "pos_embed2": params["pos_embed2"],
        "n1w": stack("n1w"), "n1b": stack("n1b"),
        "n2w": stack("n2w"), "n2b": stack("n2b"),
        "n3w": stack("n3w"), "n3b": stack("n3b"),
        "pb": stack("pb"),
        "wq": jnp.stack([(b["wq"] * scale).astype(bf16) for b in blocks], axis=0),   # (depth,C,C)
        "wkv": jnp.stack([jnp.concatenate([b["wk"], b["wv"]], axis=1).astype(bf16)
                          for b in blocks], axis=0),                                 # (depth,C,2C)
        "wp": jnp.stack([b["wp"].astype(bf16) for b in blocks], axis=0),             # (depth,C,C)
        "fc1": jnp.stack([b["fc1"].astype(bf16) for b in blocks], axis=0),           # (depth,C,hid)
        "fc2": jnp.stack([b["fc2"].astype(bf16) for b in blocks], axis=0),           # (depth,hid,C)
    }


def cross_transformer_forward(q, k, prepared, num_heads):
    """Pallas forward for CrossTransformer: pos-embed adds + depth-fused block stack."""
    B, Nq, C = q.shape
    _, Nk, _ = k.shape
    depth = prepared["wq"].shape[0]
    hidden = prepared["fc1"].shape[-1]
    H = num_heads
    assert C % H == 0

    q = (q + prepared["pos_embed"]).astype(jnp.float32)
    k = (k + prepared["pos_embed2"]).astype(jnp.bfloat16)   # halves K DMA/VMEM footprint

    wnames = ["n1w", "n1b", "n2w", "n2b", "n3w", "n3b",
              "wq", "wkv", "wp", "pb", "fc1", "fc2"]
    weights = [prepared[n] for n in wnames]

    def wspec(arr):
        nd = arr.ndim
        # Select this block's (depth-indexed) weight slab; full extent on trailing dims.
        return pl.BlockSpec((1,) + arr.shape[1:], lambda b, d, _nd=nd: (d,) + (0,) * (_nd - 1))

    in_specs = [
        pl.BlockSpec((1, Nq, C), lambda b, d: (b, 0, 0)),   # query (read only at d == 0)
        pl.BlockSpec((1, Nk, C), lambda b, d: (b, 0, 0)),   # key/value source (resident per b)
    ] + [wspec(w) for w in weights]
    # Constant over depth -> output block acts as the resident residual-stream accumulator.
    out_spec = pl.BlockSpec((1, Nq, C), lambda b, d: (b, 0, 0))

    # Advisory cost estimate matching actual compute / DMA traffic.
    macs = B * depth * (Nq * C * C + Nk * C * 2 * C + 2 * Nq * Nk * C
                        + Nq * C * C + 2 * Nq * C * hidden)
    weight_bytes = sum(int(w.size) * w.dtype.itemsize for w in weights)
    cost = pl.CostEstimate(
        flops=int(2 * macs),
        transcendentals=int(B * depth * (H * Nq * Nk + Nq * hidden)),
        bytes_accessed=int(2 * q.size * q.dtype.itemsize       # q read + q written
                           + k.size * k.dtype.itemsize         # k fetched once per batch
                           + B * weight_bytes),                 # weights re-fetched per batch
    )

    fn = pl.pallas_call(
        functools.partial(fused_kernel, num_heads=H),
        out_shape=jax.ShapeDtypeStruct((B, Nq, C), jnp.float32),
        grid=(B, depth),
        in_specs=in_specs,
        out_specs=out_spec,
        compiler_params=pltpu.CompilerParams(
            # Batch axis shards across TensorCores (v7x megacore); depth must stay
            # sequential because the output block carries the residual stream.
            dimension_semantics=("parallel", "arbitrary"),
            vmem_limit_bytes=40 * 1024 * 1024,   # <= 40 MiB: headroom on v7x's 64 MiB
        ),
        cost_estimate=cost,
    )
    return fn(q, k, *weights)


def cross_transformer_reference(q, k, params, num_heads):
    """Pure-JAX f32 reference matching the PyTorch CrossTransformer forward (eval mode)."""
    def ln(x, w, b):
        mu = x.mean(-1, keepdims=True)
        var = ((x - mu) ** 2).mean(-1, keepdims=True)
        return (x - mu) / jnp.sqrt(var + EPS) * w[0] + b[0]

    def block(q, k, p):
        B, Nq, C = q.shape
        Nk = k.shape[1]
        H = num_heads
        D = C // H
        qn = ln(q, p["n1w"], p["n1b"])
        kn = ln(k, p["n2w"], p["n2b"])
        Q = (qn @ p["wq"]).reshape(B, Nq, H, D).transpose(0, 2, 1, 3)
        K = (kn @ p["wk"]).reshape(B, Nk, H, D).transpose(0, 2, 1, 3)
        V = (kn @ p["wv"]).reshape(B, Nk, H, D).transpose(0, 2, 1, 3)
        attn = jax.nn.softmax((Q @ jnp.swapaxes(K, -2, -1)) * (D ** -0.5), axis=-1)
        x = (attn @ V).transpose(0, 2, 1, 3).reshape(B, Nq, C)
        x = x @ p["wp"] + p["pb"][0]
        out = q + x
        xn = ln(out, p["n3w"], p["n3b"])
        h = jax.nn.gelu(xn @ p["fc1"], approximate=False)
        return out + h @ p["fc2"]

    q = q + params["pos_embed"]
    k = k + params["pos_embed2"]
    for p in params["blocks"]:
        q = block(q, k, p)
    return q


def make_block_params(key, dim, hidden):
    ks = jax.random.split(key, 13)
    n = lambda kk, shape, s: jax.random.normal(kk, shape, jnp.float32) * s
    return {
        # LayerNorm affine params kept 2D (1, C) for lane-friendly layout (f32).
        "n1w": 1.0 + n(ks[0], (1, dim), 0.1), "n1b": n(ks[1], (1, dim), 0.1),
        "n2w": 1.0 + n(ks[2], (1, dim), 0.1), "n2b": n(ks[3], (1, dim), 0.1),
        "n3w": 1.0 + n(ks[4], (1, dim), 0.1), "n3b": n(ks[5], (1, dim), 0.1),
        # attention projections, stored (in, out); qkv_bias=False, proj has bias
        "wq": n(ks[6], (dim, dim), dim ** -0.5),
        "wk": n(ks[7], (dim, dim), dim ** -0.5),
        "wv": n(ks[8], (dim, dim), dim ** -0.5),
        "wp": n(ks[9], (dim, dim), dim ** -0.5),
        "pb": n(ks[10], (1, dim), 0.02),
        # MLP (bias=False in Mlp default)
        "fc1": n(ks[11], (dim, hidden), dim ** -0.5),
        "fc2": n(ks[12], (hidden, dim), hidden ** -0.5),
    }


def make_cross_transformer_params(key, dim, num_token, depth, hidden):
    kpe1, kpe2, kb = jax.random.split(key, 3)
    nq = num_token * num_token
    nk = 1 + 2 * num_token * num_token
    return {
        "pos_embed": jax.random.normal(kpe1, (1, nq, dim), jnp.float32),
        "pos_embed2": jax.random.normal(kpe2, (1, nk, dim), jnp.float32),
        "blocks": [make_block_params(jax.random.fold_in(kb, i), dim, hidden)
                   for i in range(depth)],
    }


if __name__ == "__main__":
    # Small config consistent with CrossTransformer(in_chans=C, num_token=4, depth=2,
    # num_heads=4): Nq = 16, Nk = 33; C = 128 keeps the lane dim dense.
    B, num_token, C, num_heads, depth, mlp_ratio = 2, 4, 128, 4, 2, 4.0
    Nq = num_token * num_token
    Nk = 1 + 2 * num_token * num_token
    hidden = int(C * mlp_ratio)

    key = jax.random.PRNGKey(0)
    kq, kk, kp = jax.random.split(key, 3)
    q = jax.random.normal(kq, (B, Nq, C), jnp.float32)
    k = jax.random.normal(kk, (B, Nk, C), jnp.float32)
    params = make_cross_transformer_params(kp, C, num_token, depth, hidden)

    # Weight relayout / bf16 cast happens once, outside the jitted per-step path.
    prepared = prepare_cross_transformer_params(params, num_heads)
    fwd = jax.jit(functools.partial(cross_transformer_forward, num_heads=num_heads))
    out = jax.block_until_ready(fwd(q, k, prepared))

    ref = cross_transformer_reference(q, k, params, num_heads)
    assert out.shape == (B, Nq, C)
    max_diff = float(jnp.max(jnp.abs(out - ref)))
    # bf16 MXU operands (f32 accumulation), bf16 K, and approx softmax reciprocal vs f32 ref.
    assert jnp.allclose(out, ref, atol=1e-1, rtol=1e-1), f"max abs diff {max_diff}"

    print("KERNEL_OK")
</pallas_src>

<mosaic_0001>
module attributes {stable_mosaic.version = 11 : i64} {
  func.func @fused_kernel(%arg0: i32, %arg1: i32, %arg2: memref<1x16x128xf32, #tpu.memory_space<vmem>>, %arg3: memref<1x33x128xbf16, #tpu.memory_space<vmem>>, %arg4: memref<1x1x128xf32, #tpu.memory_space<vmem>>, %arg5: memref<1x1x128xf32, #tpu.memory_space<vmem>>, %arg6: memref<1x1x128xf32, #tpu.memory_space<vmem>>, %arg7: memref<1x1x128xf32, #tpu.memory_space<vmem>>, %arg8: memref<1x1x128xf32, #tpu.memory_space<vmem>>, %arg9: memref<1x1x128xf32, #tpu.memory_space<vmem>>, %arg10: memref<1x128x128xbf16, #tpu.memory_space<vmem>>, %arg11: memref<1x128x256xbf16, #tpu.memory_space<vmem>>, %arg12: memref<1x128x128xbf16, #tpu.memory_space<vmem>>, %arg13: memref<1x1x128xf32, #tpu.memory_space<vmem>>, %arg14: memref<1x128x512xbf16, #tpu.memory_space<vmem>>, %arg15: memref<1x512x128xbf16, #tpu.memory_space<vmem>>, %arg16: memref<1x16x128xf32, #tpu.memory_space<vmem>>) attributes {dimension_semantics = [#tpu.dimension_semantics<parallel>, #tpu.dimension_semantics<arbitrary>], iteration_bounds = array<i64: 2, 2>, scalar_prefetch = 0 : i64, scratch_operands = 0 : i64, tpu.core_type = #tpu.core_type<tc>, window_params = [{transform_indices = @transform_0, window_bounds = array<i64: 1, 16, 128>}, {transform_indices = @transform_1, window_bounds = array<i64: 1, 33, 128>}, {transform_indices = @transform_2, window_bounds = array<i64: 1, 1, 128>}, {transform_indices = @transform_3, window_bounds = array<i64: 1, 1, 128>}, {transform_indices = @transform_4, window_bounds = array<i64: 1, 1, 128>}, {transform_indices = @transform_5, window_bounds = array<i64: 1, 1, 128>}, {transform_indices = @transform_6, window_bounds = array<i64: 1, 1, 128>}, {transform_indices = @transform_7, window_bounds = array<i64: 1, 1, 128>}, {transform_indices = @transform_8, window_bounds = array<i64: 1, 128, 128>}, {transform_indices = @transform_9, window_bounds = array<i64: 1, 128, 256>}, {transform_indices = @transform_10, window_bounds = array<i64: 1, 128, 128>}, {transform_indices = @transform_11, window_bounds = array<i64: 1, 1, 128>}, {transform_indices = @transform_12, window_bounds = array<i64: 1, 128, 512>}, {transform_indices = @transform_13, window_bounds = array<i64: 1, 512, 128>}, {transform_indices = @transform_14, window_bounds = array<i64: 1, 16, 128>}]} {
    %c0_i32 = arith.constant 0 : i32
    %0 = arith.cmpi eq, %arg1, %c0_i32 : i32
    %1 = arith.extui %0 : i1 to i32
    %c0_i32_0 = arith.constant 0 : i32
    %2 = arith.cmpi ne, %1, %c0_i32_0 : i32
    scf.if %2 {
      %c0_96 = arith.constant 0 : index
      %c0_97 = arith.constant 0 : index
      %c0_98 = arith.constant 0 : index
      %225 = vector.load %arg2[%c0_96, %c0_97, %c0_98] : memref<1x16x128xf32, #tpu.memory_space<vmem>>, vector<1x16x128xf32>
      %c0_99 = arith.constant 0 : index
      %c0_100 = arith.constant 0 : index
      %c0_101 = arith.constant 0 : index
      %226 = vector.load %arg16[%c0_99, %c0_100, %c0_101] : memref<1x16x128xf32, #tpu.memory_space<vmem>>, vector<1x16x128xf32>
      tpu.vector_store %arg16[%c0_99, %c0_100, %c0_101], %225 {strides = array<i32>} : memref<1x16x128xf32, #tpu.memory_space<vmem>>, vector<1x16x128xf32>,
    } else {
    }
    %c0 = arith.constant 0 : index
    %c0_1 = arith.constant 0 : index
    %c0_2 = arith.constant 0 : index
    %3 = vector.load %arg16[%c0, %c0_1, %c0_2] : memref<1x16x128xf32, #tpu.memory_space<vmem>>, vector<1x16x128xf32>
    %4 = vector.shape_cast %3 : vector<1x16x128xf32> to vector<16x128xf32>
    %c0_3 = arith.constant 0 : index
    %c0_4 = arith.constant 0 : index
    %c0_5 = arith.constant 0 : index
    %5 = vector.load %arg3[%c0_3, %c0_4, %c0_5] : memref<1x33x128xbf16, #tpu.memory_space<vmem>>, vector<1x33x128xbf16>
    %6 = vector.shape_cast %5 : vector<1x33x128xbf16> to vector<33x128xbf16>
    %7 = arith.extf %6 : vector<33x128xbf16> to vector<33x128xf32>
    %c0_6 = arith.constant 0 : index
    %c0_7 = arith.constant 0 : index
    %c0_8 = arith.constant 0 : index
    %8 = vector.load %arg4[%c0_6, %c0_7, %c0_8] : memref<1x1x128xf32, #tpu.memory_space<vmem>>, vector<1x1x128xf32>
    %9 = vector.shape_cast %8 : vector<1x1x128xf32> to vector<1x128xf32>
    %c0_9 = arith.constant 0 : index
    %c0_10 = arith.constant 0 : index
    %c0_11 = arith.constant 0 : index
    %10 = vector.load %arg5[%c0_9, %c0_10, %c0_11] : memref<1x1x128xf32, #tpu.memory_space<vmem>>, vector<1x1x128xf32>
    %11 = vector.shape_cast %10 : vector<1x1x128xf32> to vector<1x128xf32>
    %cst = arith.constant dense<0.000000e+00> : vector<16xf32>
    %12 = vector.multi_reduction <add>, %4, %cst [1] : vector<16x128xf32> to vector<16xf32>
    %13 = vector.shape_cast %12 : vector<16xf32> to vector<16x1xf32>
    %cst_12 = arith.constant 1.280000e+02 : f32
    %14 = vector.broadcast %cst_12 : f32 to vector<16x1xf32>
    %15 = arith.divf %13, %14 : vector<16x1xf32>
    %16 = vector.broadcast %15 : vector<16x1xf32> to vector<16x128xf32>
    %17 = arith.subf %4, %16 : vector<16x128xf32>
    %18 = arith.mulf %17, %17 : vector<16x128xf32>
    %cst_13 = arith.constant dense<0.000000e+00> : vector<16xf32>
    %19 = vector.multi_reduction <add>, %18, %cst_13 [1] : vector<16x128xf32> to vector<16xf32>
    %20 = vector.shape_cast %19 : vector<16xf32> to vector<16x1xf32>
    %cst_14 = arith.constant 1.280000e+02 : f32
    %21 = vector.broadcast %cst_14 : f32 to vector<16x1xf32>
    %22 = arith.divf %20, %21 : vector<16x1xf32>
    %23 = vector.broadcast %15 : vector<16x1xf32> to vector<16x128xf32>
    %24 = arith.subf %4, %23 : vector<16x128xf32>
    %cst_15 = arith.constant 9.99999974E-6 : f32
    %25 = vector.broadcast %cst_15 : f32 to vector<16x1xf32>
    %26 = arith.addf %22, %25 : vector<16x1xf32>
    %27 = math.rsqrt %26 : vector<16x1xf32>
    %28 = vector.broadcast %27 : vector<16x1xf32> to vector<16x128xf32>
    %29 = arith.mulf %24, %28 : vector<16x128xf32>
    %30 = vector.broadcast %9 : vector<1x128xf32> to vector<16x128xf32>
    %31 = arith.mulf %29, %30 : vector<16x128xf32>
    %32 = vector.broadcast %11 : vector<1x128xf32> to vector<16x128xf32>
    %33 = arith.addf %31, %32 : vector<16x128xf32>
    %34 = arith.truncf %33 : vector<16x128xf32> to vector<16x128xbf16>
    %c0_16 = arith.constant 0 : index
    %c0_17 = arith.constant 0 : index
    %c0_18 = arith.constant 0 : index
    %35 = vector.load %arg6[%c0_16, %c0_17, %c0_18] : memref<1x1x128xf32, #tpu.memory_space<vmem>>, vector<1x1x128xf32>
    %36 = vector.shape_cast %35 : vector<1x1x128xf32> to vector<1x128xf32>
    %c0_19 = arith.constant 0 : index
    %c0_20 = arith.constant 0 : index
    %c0_21 = arith.constant 0 : index
    %37 = vector.load %arg7[%c0_19, %c0_20, %c0_21] : memref<1x1x128xf32, #tpu.memory_space<vmem>>, vector<1x1x128xf32>
    %38 = vector.shape_cast %37 : vector<1x1x128xf32> to vector<1x128xf32>
    %cst_22 = arith.constant dense<0.000000e+00> : vector<33xf32>
    %39 = vector.multi_reduction <add>, %7, %cst_22 [1] : vector<33x128xf32> to vector<33xf32>
    %40 = vector.shape_cast %39 : vector<33xf32> to vector<33x1xf32>
    %cst_23 = arith.constant 1.280000e+02 : f32
    %41 = vector.broadcast %cst_23 : f32 to vector<33x1xf32>
    %42 = arith.divf %40, %41 : vector<33x1xf32>
    %43 = vector.broadcast %42 : vector<33x1xf32> to vector<33x128xf32>
    %44 = arith.subf %7, %43 : vector<33x128xf32>
    %45 = arith.mulf %44, %44 : vector<33x128xf32>
    %cst_24 = arith.constant dense<0.000000e+00> : vector<33xf32>
    %46 = vector.multi_reduction <add>, %45, %cst_24 [1] : vector<33x128xf32> to vector<33xf32>
    %47 = vector.shape_cast %46 : vector<33xf32> to vector<33x1xf32>
    %cst_25 = arith.constant 1.280000e+02 : f32
    %48 = vector.broadcast %cst_25 : f32 to vector<33x1xf32>
    %49 = arith.divf %47, %48 : vector<33x1xf32>
    %50 = vector.broadcast %42 : vector<33x1xf32> to vector<33x128xf32>
    %51 = arith.subf %7, %50 : vector<33x128xf32>
    %cst_26 = arith.constant 9.99999974E-6 : f32
    %52 = vector.broadcast %cst_26 : f32 to vector<33x1xf32>
    %53 = arith.addf %49, %52 : vector<33x1xf32>
    %54 = math.rsqrt %53 : vector<33x1xf32>
    %55 = vector.broadcast %54 : vector<33x1xf32> to vector<33x128xf32>
    %56 = arith.mulf %51, %55 : vector<33x128xf32>
    %57 = vector.broadcast %36 : vector<1x128xf32> to vector<33x128xf32>
    %58 = arith.mulf %56, %57 : vector<33x128xf32>
    %59 = vector.broadcast %38 : vector<1x128xf32> to vector<33x128xf32>
    %60 = arith.addf %58, %59 : vector<33x128xf32>
    %61 = arith.truncf %60 : vector<33x128xf32> to vector<33x128xbf16>
    %c0_27 = arith.constant 0 : index
    %c0_28 = arith.constant 0 : index
    %c0_29 = arith.constant 0 : index
    %62 = vector.load %arg10[%c0_27, %c0_28, %c0_29] : memref<1x128x128xbf16, #tpu.memory_space<vmem>>, vector<1x128x128xbf16>
    %63 = vector.shape_cast %62 : vector<1x128x128xbf16> to vector<128x128xbf16>
    %cst_30 = arith.constant dense<0.000000e+00> : vector<16x128xf32>
    %64 = tpu.matmul %34, %63, %cst_30 {dimension_numbers = #tpu.dot_dimension_numbers<[1], [0], [0], [1], [0, 0, 1, 1], [], []>} : vector<16x128xbf16>, vector<128x128xbf16>, vector<16x128xf32> -> vector<16x128xf32>
    %65 = arith.truncf %64 : vector<16x128xf32> to vector<16x128xbf16>
    %c0_31 = arith.constant 0 : index
    %c0_32 = arith.constant 0 : index
    %c0_33 = arith.constant 0 : index
    %66 = vector.load %arg11[%c0_31, %c0_32, %c0_33] : memref<1x128x256xbf16, #tpu.memory_space<vmem>>, vector<1x128x256xbf16>
    %67 = vector.shape_cast %66 : vector<1x128x256xbf16> to vector<128x256xbf16>
    %cst_34 = arith.constant dense<0.000000e+00> : vector<33x256xf32>
    %68 = tpu.matmul %61, %67, %cst_34 {dimension_numbers = #tpu.dot_dimension_numbers<[1], [0], [0], [1], [0, 0, 1, 1], [], []>} : vector<33x128xbf16>, vector<128x256xbf16>, vector<33x256xf32> -> vector<33x256xf32>
    %69 = arith.truncf %68 : vector<33x256xf32> to vector<33x256xbf16>
    %70 = vector.extract_strided_slice %69 {offsets = [0, 0], sizes = [33, 128], strides = [1, 1]} : vector<33x256xbf16> to vector<33x128xbf16>
    %71 = vector.extract_strided_slice %69 {offsets = [0, 128], sizes = [33, 128], strides = [1, 1]} : vector<33x256xbf16> to vector<33x128xbf16>
    %72 = vector.extract_strided_slice %65 {offsets = [0, 0], sizes = [16, 32], strides = [1, 1]} : vector<16x128xbf16> to vector<16x32xbf16>
    %73 = vector.extract_strided_slice %70 {offsets = [0, 0], sizes = [33, 32], strides = [1, 1]} : vector<33x128xbf16> to vector<33x32xbf16>
    %74 = vector.extract_strided_slice %71 {offsets = [0, 0], sizes = [33, 32], strides = [1, 1]} : vector<33x128xbf16> to vector<33x32xbf16>
    %cst_35 = arith.constant dense<0.000000e+00> : vector<16x33xf32>
    %75 = tpu.matmul %72, %73, %cst_35 {dimension_numbers = #tpu.dot_dimension_numbers<[1], [1], [0], [0], [0, 0, 1, 0], [], []>} : vector<16x32xbf16>, vector<33x32xbf16>, vector<16x33xf32> -> vector<16x33xf32>
    %cst_36 = arith.constant dense<0xFF800000> : vector<16xf32>
    %76 = vector.multi_reduction <maximumf>, %75, %cst_36 [1] : vector<16x33xf32> to vector<16xf32>
    %77 = vector.shape_cast %76 : vector<16xf32> to vector<16x1xf32>
    %78 = vector.broadcast %77 : vector<16x1xf32> to vector<16x33xf32>
    %79 = arith.subf %75, %78 : vector<16x33xf32>
    %80 = math.exp %79 : vector<16x33xf32>
    %cst_37 = arith.constant dense<0.000000e+00> : vector<16xf32>
    %81 = vector.multi_reduction <add>, %80, %cst_37 [1] : vector<16x33xf32> to vector<16xf32>
    %82 = vector.shape_cast %81 : vector<16xf32> to vector<16x1xf32>
    %83 = tpu.reciprocal %82 {approx = true} : vector<16x1xf32> -> vector<16x1xf32>
    %84 = vector.broadcast %83 : vector<16x1xf32> to vector<16x33xf32>
    %85 = arith.mulf %80, %84 : vector<16x33xf32>
    %86 = arith.truncf %85 : vector<16x33xf32> to vector<16x33xbf16>
    %cst_38 = arith.constant dense<0.000000e+00> : vector<16x32xf32>
    %87 = tpu.matmul %86, %74, %cst_38 {dimension_numbers = #tpu.dot_dimension_numbers<[1], [0], [0], [1], [0, 0, 1, 1], [], []>} : vector<16x33xbf16>, vector<33x32xbf16>, vector<16x32xf32> -> vector<16x32xf32>
    %88 = vector.extract_strided_slice %65 {offsets = [0, 32], sizes = [16, 32], strides = [1, 1]} : vector<16x128xbf16> to vector<16x32xbf16>
    %89 = vector.extract_strided_slice %70 {offsets = [0, 32], sizes = [33, 32], strides = [1, 1]} : vector<33x128xbf16> to vector<33x32xbf16>
    %90 = vector.extract_strided_slice %71 {offsets = [0, 32], sizes = [33, 32], strides = [1, 1]} : vector<33x128xbf16> to vector<33x32xbf16>
    %cst_39 = arith.constant dense<0.000000e+00> : vector<16x33xf32>
    %91 = tpu.matmul %88, %89, %cst_39 {dimension_numbers = #tpu.dot_dimension_numbers<[1], [1], [0], [0], [0, 0, 1, 0], [], []>} : vector<16x32xbf16>, vector<33x32xbf16>, vector<16x33xf32> -> vector<16x33xf32>
    %cst_40 = arith.constant dense<0xFF800000> : vector<16xf32>
    %92 = vector.multi_reduction <maximumf>, %91, %cst_40 [1] : vector<16x33xf32> to vector<16xf32>
    %93 = vector.shape_cast %92 : vector<16xf32> to vector<16x1xf32>
    %94 = vector.broadcast %93 : vector<16x1xf32> to vector<16x33xf32>
    %95 = arith.subf %91, %94 : vector<16x33xf32>
    %96 = math.exp %95 : vector<16x33xf32>
    %cst_41 = arith.constant dense<0.000000e+00> : vector<16xf32>
    %97 = vector.multi_reduction <add>, %96, %cst_41 [1] : vector<16x33xf32> to vector<16xf32>
    %98 = vector.shape_cast %97 : vector<16xf32> to vector<16x1xf32>
    %99 = tpu.reciprocal %98 {approx = true} : vector<16x1xf32> -> vector<16x1xf32>
    %100 = vector.broadcast %99 : vector<16x1xf32> to vector<16x33xf32>
    %101 = arith.mulf %96, %100 : vector<16x33xf32>
    %102 = arith.truncf %101 : vector<16x33xf32> to vector<16x33xbf16>
    %cst_42 = arith.constant dense<0.000000e+00> : vector<16x32xf32>
    %103 = tpu.matmul %102, %90, %cst_42 {dimension_numbers = #tpu.dot_dimension_numbers<[1], [0], [0], [1], [0, 0, 1, 1], [], []>} : vector<16x33xbf16>, vector<33x32xbf16>, vector<16x32xf32> -> vector<16x32xf32>
    %104 = vector.extract_strided_slice %65 {offsets = [0, 64], sizes = [16, 32], strides = [1, 1]} : vector<16x128xbf16> to vector<16x32xbf16>
    %105 = vector.extract_strided_slice %70 {offsets = [0, 64], sizes = [33, 32], strides = [1, 1]} : vector<33x128xbf16> to vector<33x32xbf16>
    %106 = vector.extract_strided_slice %71 {offsets = [0, 64], sizes = [33, 32], strides = [1, 1]} : vector<33x128xbf16> to vector<33x32xbf16>
    %cst_43 = arith.constant dense<0.000000e+00> : vector<16x33xf32>
    %107 = tpu.matmul %104, %105, %cst_43 {dimension_numbers = #tpu.dot_dimension_numbers<[1], [1], [0], [0], [0, 0, 1, 0], [], []>} : vector<16x32xbf16>, vector<33x32xbf16>, vector<16x33xf32> -> vector<16x33xf32>
    %cst_44 = arith.constant dense<0xFF800000> : vector<16xf32>
    %108 = vector.multi_reduction <maximumf>, %107, %cst_44 [1] : vector<16x33xf32> to vector<16xf32>
    %109 = vector.shape_cast %108 : vector<16xf32> to vector<16x1xf32>
    %110 = vector.broadcast %109 : vector<16x1xf32> to vector<16x33xf32>
    %111 = arith.subf %107, %110 : vector<16x33xf32>
    %112 = math.exp %111 : vector<16x33xf32>
    %cst_45 = arith.constant dense<0.000000e+00> : vector<16xf32>
    %113 = vector.multi_reduction <add>, %112, %cst_45 [1] : vector<16x33xf32> to vector<16xf32>
    %114 = vector.shape_cast %113 : vector<16xf32> to vector<16x1xf32>
    %115 = tpu.reciprocal %114 {approx = true} : vector<16x1xf32> -> vector<16x1xf32>
    %116 = vector.broadcast %115 : vector<16x1xf32> to vector<16x33xf32>
    %117 = arith.mulf %112, %116 : vector<16x33xf32>
    %118 = arith.truncf %117 : vector<16x33xf32> to vector<16x33xbf16>
    %cst_46 = arith.constant dense<0.000000e+00> : vector<16x32xf32>
    %119 = tpu.matmul %118, %106, %cst_46 {dimension_numbers = #tpu.dot_dimension_numbers<[1], [0], [0], [1], [0, 0, 1, 1], [], []>} : vector<16x33xbf16>, vector<33x32xbf16>, vector<16x32xf32> -> vector<16x32xf32>
    %120 = vector.extract_strided_slice %65 {offsets = [0, 96], sizes = [16, 32], strides = [1, 1]} : vector<16x128xbf16> to vector<16x32xbf16>
    %121 = vector.extract_strided_slice %70 {offsets = [0, 96], sizes = [33, 32], strides = [1, 1]} : vector<33x128xbf16> to vector<33x32xbf16>
    %122 = vector.extract_strided_slice %71 {offsets = [0, 96], sizes = [33, 32], strides = [1, 1]} : vector<33x128xbf16> to vector<33x32xbf16>
    %cst_47 = arith.constant dense<0.000000e+00> : vector<16x33xf32>
    %123 = tpu.matmul %120, %121, %cst_47 {dimension_numbers = #tpu.dot_dimension_numbers<[1], [1], [0], [0], [0, 0, 1, 0], [], []>} : vector<16x32xbf16>, vector<33x32xbf16>, vector<16x33xf32> -> vector<16x33xf32>
    %cst_48 = arith.constant dense<0xFF800000> : vector<16xf32>
    %124 = vector.multi_reduction <maximumf>, %123, %cst_48 [1] : vector<16x33xf32> to vector<16xf32>
    %125 = vector.shape_cast %124 : vector<16xf32> to vector<16x1xf32>
    %126 = vector.broadcast %125 : vector<16x1xf32> to vector<16x33xf32>
    %127 = arith.subf %123, %126 : vector<16x33xf32>
    %128 = math.exp %127 : vector<16x33xf32>
    %cst_49 = arith.constant dense<0.000000e+00> : vector<16xf32>
    %129 = vector.multi_reduction <add>, %128, %cst_49 [1] : vector<16x33xf32> to vector<16xf32>
    %130 = vector.shape_cast %129 : vector<16xf32> to vector<16x1xf32>
    %131 = tpu.reciprocal %130 {approx = true} : vector<16x1xf32> -> vector<16x1xf32>
    %132 = vector.broadcast %131 : vector<16x1xf32> to vector<16x33xf32>
    %133 = arith.mulf %128, %132 : vector<16x33xf32>
    %134 = arith.truncf %133 : vector<16x33xf32> to vector<16x33xbf16>
    %cst_50 = arith.constant dense<0.000000e+00> : vector<16x32xf32>
    %135 = tpu.matmul %134, %122, %cst_50 {dimension_numbers = #tpu.dot_dimension_numbers<[1], [0], [0], [1], [0, 0, 1, 1], [], []>} : vector<16x33xbf16>, vector<33x32xbf16>, vector<16x32xf32> -> vector<16x32xf32>
    %136 = tpu.concatenate %87, %103, %119, %135 in 1 : vector<16x32xf32>, vector<16x32xf32>, vector<16x32xf32>, vector<16x32xf32> -> vector<16x128xf32>
    %137 = arith.truncf %136 : vector<16x128xf32> to vector<16x128xbf16>
    %c0_51 = arith.constant 0 : index
    %c0_52 = arith.constant 0 : index
    %c0_53 = arith.constant 0 : index
    %138 = vector.load %arg12[%c0_51, %c0_52, %c0_53] : memref<1x128x128xbf16, #tpu.memory_space<vmem>>, vector<1x128x128xbf16>
    %139 = vector.shape_cast %138 : vector<1x128x128xbf16> to vector<128x128xbf16>
    %cst_54 = arith.constant dense<0.000000e+00> : vector<16x128xf32>
    %140 = tpu.matmul %137, %139, %cst_54 {dimension_numbers = #tpu.dot_dimension_numbers<[1], [0], [0], [1], [0, 0, 1, 1], [], []>} : vector<16x128xbf16>, vector<128x128xbf16>, vector<16x128xf32> -> vector<16x128xf32>
    %c0_55 = arith.constant 0 : index
    %c0_56 = arith.constant 0 : index
    %c0_57 = arith.constant 0 : index
    %141 = vector.load %arg13[%c0_55, %c0_56, %c0_57] : memref<1x1x128xf32, #tpu.memory_space<vmem>>, vector<1x1x128xf32>
    %142 = vector.shape_cast %141 : vector<1x1x128xf32> to vector<1x128xf32>
    %143 = vector.broadcast %142 : vector<1x128xf32> to vector<16x128xf32>
    %144 = arith.addf %140, %143 : vector<16x128xf32>
    %145 = arith.addf %4, %144 : vector<16x128xf32>
    %c0_58 = arith.constant 0 : index
    %c0_59 = arith.constant 0 : index
    %c0_60 = arith.constant 0 : index
    %146 = vector.load %arg8[%c0_58, %c0_59, %c0_60] : memref<1x1x128xf32, #tpu.memory_space<vmem>>, vector<1x1x128xf32>
    %147 = vector.shape_cast %146 : vector<1x1x128xf32> to vector<1x128xf32>
    %c0_61 = arith.constant 0 : index
    %c0_62 = arith.constant 0 : index
    %c0_63 = arith.constant 0 : index
    %148 = vector.load %arg9[%c0_61, %c0_62, %c0_63] : memref<1x1x128xf32, #tpu.memory_space<vmem>>, vector<1x1x128xf32>
    %149 = vector.shape_cast %148 : vector<1x1x128xf32> to vector<1x128xf32>
    %cst_64 = arith.constant dense<0.000000e+00> : vector<16xf32>
    %150 = vector.multi_reduction <add>, %145, %cst_64 [1] : vector<16x128xf32> to vector<16xf32>
    %151 = vector.shape_cast %150 : vector<16xf32> to vector<16x1xf32>
    %cst_65 = arith.constant 1.280000e+02 : f32
    %152 = vector.broadcast %cst_65 : f32 to vector<16x1xf32>
    %153 = arith.divf %151, %152 : vector<16x1xf32>
    %154 = vector.broadcast %153 : vector<16x1xf32> to vector<16x128xf32>
    %155 = arith.subf %145, %154 : vector<16x128xf32>
    %156 = arith.mulf %155, %155 : vector<16x128xf32>
    %cst_66 = arith.constant dense<0.000000e+00> : vector<16xf32>
    %157 = vector.multi_reduction <add>, %156, %cst_66 [1] : vector<16x128xf32> to vector<16xf32>
    %158 = vector.shape_cast %157 : vector<16xf32> to vector<16x1xf32>
    %cst_67 = arith.constant 1.280000e+02 : f32
    %159 = vector.broadcast %cst_67 : f32 to vector<16x1xf32>
    %160 = arith.divf %158, %159 : vector<16x1xf32>
    %161 = vector.broadcast %153 : vector<16x1xf32> to vector<16x128xf32>
    %162 = arith.subf %145, %161 : vector<16x128xf32>
    %cst_68 = arith.constant 9.99999974E-6 : f32
    %163 = vector.broadcast %cst_68 : f32 to vector<16x1xf32>
    %164 = arith.addf %160, %163 : vector<16x1xf32>
    %165 = math.rsqrt %164 : vector<16x1xf32>
    %166 = vector.broadcast %165 : vector<16x1xf32> to vector<16x128xf32>
    %167 = arith.mulf %162, %166 : vector<16x128xf32>
    %168 = vector.broadcast %147 : vector<1x128xf32> to vector<16x128xf32>
    %169 = arith.mulf %167, %168 : vector<16x128xf32>
    %170 = vector.broadcast %149 : vector<1x128xf32> to vector<16x128xf32>
    %171 = arith.addf %169, %170 : vector<16x128xf32>
    %172 = arith.truncf %171 : vector<16x128xf32> to vector<16x128xbf16>
    %c0_69 = arith.constant 0 : index
    %c0_70 = arith.constant 0 : index
    %c0_71 = arith.constant 0 : index
    %173 = vector.load %arg14[%c0_69, %c0_70, %c0_71] : memref<1x128x512xbf16, #tpu.memory_space<vmem>>, vector<1x128x512xbf16>
    %174 = vector.shape_cast %173 : vector<1x128x512xbf16> to vector<128x512xbf16>
    %cst_72 = arith.constant dense<0.000000e+00> : vector<16x512xf32>
    %175 = tpu.matmul %172, %174, %cst_72 {dimension_numbers = #tpu.dot_dimension_numbers<[1], [0], [0], [1], [0, 0, 1, 1], [], []>} : vector<16x128xbf16>, vector<128x512xbf16>, vector<16x512xf32> -> vector<16x512xf32>
    %cst_73 = arith.constant 5.000000e-01 : f32
    %176 = vector.broadcast %cst_73 : f32 to vector<16x512xf32>
    %177 = arith.mulf %176, %175 : vector<16x512xf32>
    %cst_74 = arith.constant 0.707106769 : f32
    %178 = vector.broadcast %cst_74 : f32 to vector<16x512xf32>
    %179 = arith.mulf %175, %178 : vector<16x512xf32>
    %cst_75 = arith.constant 0.000000e+00 : f32
    %180 = vector.broadcast %cst_75 : f32 to vector<16x512xf32>
    %181 = arith.cmpf oge, %179, %180 : vector<16x512xf32>
    %cst_76 = arith.constant 1.000000e+00 : f32
    %cst_77 = arith.constant -1.000000e+00 : f32
    %182 = vector.broadcast %cst_76 : f32 to vector<16x512xf32>
    %183 = vector.broadcast %cst_77 : f32 to vector<16x512xf32>
    %184 = arith.select %181, %182, %183 : vector<16x512xi1>, vector<16x512xf32>
    %185 = math.absf %179 : vector<16x512xf32>
    %cst_78 = arith.constant 0.327591091 : f32
    %186 = vector.broadcast %cst_78 : f32 to vector<16x512xf32>
    %187 = arith.mulf %186, %185 : vector<16x512xf32>
    %cst_79 = arith.constant 1.000000e+00 : f32
    %188 = vector.broadcast %cst_79 : f32 to vector<16x512xf32>
    %189 = arith.addf %188, %187 : vector<16x512xf32>
    %cst_80 = arith.constant 1.000000e+00 : f32
    %190 = vector.broadcast %cst_80 : f32 to vector<16x512xf32>
    %191 = arith.divf %190, %189 : vector<16x512xf32>
    %cst_81 = arith.constant 1.06140542 : f32
    %192 = vector.broadcast %cst_81 : f32 to vector<16x512xf32>
    %193 = arith.mulf %192, %191 : vector<16x512xf32>
    %cst_82 = arith.constant -1.45315206 : f32
    %194 = vector.broadcast %cst_82 : f32 to vector<16x512xf32>
    %195 = arith.addf %193, %194 : vector<16x512xf32>
    %196 = arith.mulf %195, %191 : vector<16x512xf32>
    %cst_83 = arith.constant 1.42141378 : f32
    %197 = vector.broadcast %cst_83 : f32 to vector<16x512xf32>
    %198 = arith.addf %196, %197 : vector<16x512xf32>
    %199 = arith.mulf %198, %191 : vector<16x512xf32>
    %cst_84 = arith.constant -0.284496725 : f32
    %200 = vector.broadcast %cst_84 : f32 to vector<16x512xf32>
    %201 = arith.addf %199, %200 : vector<16x512xf32>
    %202 = arith.mulf %201, %191 : vector<16x512xf32>
    %cst_85 = arith.constant 0.254829586 : f32
    %203 = vector.broadcast %cst_85 : f32 to vector<16x512xf32>
    %204 = arith.addf %202, %203 : vector<16x512xf32>
    %205 = arith.mulf %204, %191 : vector<16x512xf32>
    %cst_86 = arith.constant 0.000000e+00 : f32
    %206 = vector.broadcast %cst_86 : f32 to vector<16x512xf32>
    %207 = arith.subf %206, %185 : vector<16x512xf32>
    %208 = arith.mulf %207, %185 : vector<16x512xf32>
    %209 = math.exp %208 : vector<16x512xf32>
    %210 = arith.mulf %205, %209 : vector<16x512xf32>
    %cst_87 = arith.constant 1.000000e+00 : f32
    %211 = vector.broadcast %cst_87 : f32 to vector<16x512xf32>
    %212 = arith.subf %211, %210 : vector<16x512xf32>
    %213 = arith.mulf %184, %212 : vector<16x512xf32>
    %cst_88 = arith.constant 1.000000e+00 : f32
    %214 = vector.broadcast %cst_88 : f32 to vector<16x512xf32>
    %215 = arith.addf %214, %213 : vector<16x512xf32>
    %216 = arith.mulf %177, %215 : vector<16x512xf32>
    %217 = arith.truncf %216 : vector<16x512xf32> to vector<16x512xbf16>
    %c0_89 = arith.constant 0 : index
    %c0_90 = arith.constant 0 : index
    %c0_91 = arith.constant 0 : index
    %218 = vector.load %arg15[%c0_89, %c0_90, %c0_91] : memref<1x512x128xbf16, #tpu.memory_space<vmem>>, vector<1x512x128xbf16>
    %219 = vector.shape_cast %218 : vector<1x512x128xbf16> to vector<512x128xbf16>
    %cst_92 = arith.constant dense<0.000000e+00> : vector<16x128xf32>
    %220 = tpu.matmul %217, %219, %cst_92 {dimension_numbers = #tpu.dot_dimension_numbers<[1], [0], [0], [1], [0, 0, 1, 1], [], []>} : vector<16x512xbf16>, vector<512x128xbf16>, vector<16x128xf32> -> vector<16x128xf32>
    %221 = arith.addf %145, %220 : vector<16x128xf32>
    %c0_93 = arith.constant 0 : index
    %c0_94 = arith.constant 0 : index
    %c0_95 = arith.constant 0 : index
    %222 = vector.load %arg16[%c0_93, %c0_94, %c0_95] : memref<1x16x128xf32, #tpu.memory_space<vmem>>, vector<1x16x128xf32>
    %223 = vector.shape_cast %222 : vector<1x16x128xf32> to vector<16x128xf32>
    %224 = vector.shape_cast %221 : vector<16x128xf32> to vector<1x16x128xf32>
    tpu.vector_store %arg16[%c0_93, %c0_94, %c0_95], %224 {strides = array<i32>} : memref<1x16x128xf32, #tpu.memory_space<vmem>>, vector<1x16x128xf32>,
    return
  }
  func.func @transform_0(%arg0: i32, %arg1: i32) -> (i32, i32, i32) {
    %c0_i32 = arith.constant 0 : i32
    %c0_i32_0 = arith.constant 0 : i32
    %c0_i32_1 = arith.constant 0 : i32
    return %arg0, %c0_i32, %c0_i32_0 : i32, i32, i32
  }
  func.func @transform_1(%arg0: i32, %arg1: i32) -> (i32, i32, i32) {
    %c0_i32 = arith.constant 0 : i32
    %c0_i32_0 = arith.constant 0 : i32
    %c0_i32_1 = arith.constant 0 : i32
    return %arg0, %c0_i32, %c0_i32_0 : i32, i32, i32
  }
  func.func @transform_2(%arg0: i32, %arg1: i32) -> (i32, i32, i32) {
    %c0_i32 = arith.constant 0 : i32
    %c0_i32_0 = arith.constant 0 : i32
    %c0_i32_1 = arith.constant 0 : i32
    return %arg1, %c0_i32, %c0_i32_0 : i32, i32, i32
  }
  func.func @transform_3(%arg0: i32, %arg1: i32) -> (i32, i32, i32) {
    %c0_i32 = arith.constant 0 : i32
    %c0_i32_0 = arith.constant 0 : i32
    %c0_i32_1 = arith.constant 0 : i32
    return %arg1, %c0_i32, %c0_i32_0 : i32, i32, i32
  }
  func.func @transform_4(%arg0: i32, %arg1: i32) -> (i32, i32, i32) {
    %c0_i32 = arith.constant 0 : i32
    %c0_i32_0 = arith.constant 0 : i32
    %c0_i32_1 = arith.constant 0 : i32
    return %arg1, %c0_i32, %c0_i32_0 : i32, i32, i32
  }
  func.func @transform_5(%arg0: i32, %arg1: i32) -> (i32, i32, i32) {
    %c0_i32 = arith.constant 0 : i32
    %c0_i32_0 = arith.constant 0 : i32
    %c0_i32_1 = arith.constant 0 : i32
    return %arg1, %c0_i32, %c0_i32_0 : i32, i32, i32
  }
  func.func @transform_6(%arg0: i32, %arg1: i32) -> (i32, i32, i32) {
    %c0_i32 = arith.constant 0 : i32
    %c0_i32_0 = arith.constant 0 : i32
    %c0_i32_1 = arith.constant 0 : i32
    return %arg1, %c0_i32, %c0_i32_0 : i32, i32, i32
  }
  func.func @transform_7(%arg0: i32, %arg1: i32) -> (i32, i32, i32) {
    %c0_i32 = arith.constant 0 : i32
    %c0_i32_0 = arith.constant 0 : i32
    %c0_i32_1 = arith.constant 0 : i32
    return %arg1, %c0_i32, %c0_i32_0 : i32, i32, i32
  }
  func.func @transform_8(%arg0: i32, %arg1: i32) -> (i32, i32, i32) {
    %c0_i32 = arith.constant 0 : i32
    %c0_i32_0 = arith.constant 0 : i32
    %c0_i32_1 = arith.constant 0 : i32
    return %arg1, %c0_i32, %c0_i32_0 : i32, i32, i32
  }
  func.func @transform_9(%arg0: i32, %arg1: i32) -> (i32, i32, i32) {
    %c0_i32 = arith.constant 0 : i32
    %c0_i32_0 = arith.constant 0 : i32
    %c0_i32_1 = arith.constant 0 : i32
    return %arg1, %c0_i32, %c0_i32_0 : i32, i32, i32
  }
  func.func @transform_10(%arg0: i32, %arg1: i32) -> (i32, i32, i32) {
    %c0_i32 = arith.constant 0 : i32
    %c0_i32_0 = arith.constant 0 : i32
    %c0_i32_1 = arith.constant 0 : i32
    return %arg1, %c0_i32, %c0_i32_0 : i32, i32, i32
  }
  func.func @transform_11(%arg0: i32, %arg1: i32) -> (i32, i32, i32) {
    %c0_i32 = arith.constant 0 : i32
    %c0_i32_0 = arith.constant 0 : i32
    %c0_i32_1 = arith.constant 0 : i32
    return %arg1, %c0_i32, %c0_i32_0 : i32, i32, i32
  }
  func.func @transform_12(%arg0: i32, %arg1: i32) -> (i32, i32, i32) {
    %c0_i32 = arith.constant 0 : i32
    %c0_i32_0 = arith.constant 0 : i32
    %c0_i32_1 = arith.constant 0 : i32
    return %arg1, %c0_i32, %c0_i32_0 : i32, i32, i32
  }
  func.func @transform_13(%arg0: i32, %arg1: i32) -> (i32, i32, i32) {
    %c0_i32 = arith.constant 0 : i32
    %c0_i32_0 = arith.constant 0 : i32
    %c0_i32_1 = arith.constant 0 : i32
    return %arg1, %c0_i32, %c0_i32_0 : i32, i32, i32
  }
  func.func @transform_14(%arg0: i32, %arg1: i32) -> (i32, i32, i32) {
    %c0_i32 = arith.constant 0 : i32
    %c0_i32_0 = arith.constant 0 : i32
    %c0_i32_1 = arith.constant 0 : i32
    return %arg0, %c0_i32, %c0_i32_0 : i32, i32, i32
  }
}

</mosaic_0001>

<bundles_post_ra>
// kernel: cross_transformer_forward.1
= control target key start
LH: loop header
LB: loop body
LE: loop exit
PB: predicated region body
PF: predicated region fallthrough
CT: control target
= control target key end

     0   :  { %s5520_s0 = inlined_call_operand.vmem [shape: f32[2,16,128], index: 0, kind: input, shape index: {}]   ;;  %s5521_s1 = inlined_call_operand.vmem [shape: bf16[2,33,128], index: 1, kind: input, shape index: {}]   ;;  %s5522_s2 = inlined_call_operand.vmem [shape: f32[2,1,128], index: 2, kind: input, shape index: {}]   ;;  %s5523_s3 = inlined_call_operand.vmem [shape: f32[2,1,128], index: 3, kind: input, shape index: {}]   ;;  %s5524_s4 = inlined_call_operand.hbm [shape: f32[2,1,128], index: 4, kind: input, shape index: {}]   ;;  %s5525_s5 = inlined_call_operand.hbm [shape: f32[2,1,128], index: 5, kind: input, shape index: {}]   ;;  %s5526_s6 = inlined_call_operand.hbm [shape: f32[2,1,128], index: 6, kind: input, shape index: {}]   ;;  %s5527_s7 = inlined_call_operand.hbm [shape: f32[2,1,128], index: 7, kind: input, shape index: {}]   ;;  %s5528_s8 = inlined_call_operand.hbm [shape: bf16[2,128,128], index: 8, kind: input, shape index: {}]   ;;  %s5529_s9 = inlined_call_operand.vmem [shape: bf16[2,128,256], index: 9, kind: input, shape index: {}]   ;;  %s5530_s10 = inlined_call_operand.hbm [shape: bf16[2,128,128], index: 10, kind: input, shape index: {}]   ;;  %s5531_s11 = inlined_call_operand.hbm [shape: f32[2,1,128], index: 11, kind: input, shape index: {}]   ;;  %s5532_s12 = inlined_call_operand.hbm [shape: bf16[2,128,512], index: 12, kind: input, shape index: {}]   ;;  %s5533_s13 = inlined_call_operand.hbm [shape: bf16[2,512,128], index: 13, kind: input, shape index: {}]   ;;  %s5534_s14 = inlined_call_operand.hbm [shape: f32[2,16,128], index: 14, kind: output, shape index: {}]  }
   0x1   :  { %5566 = sst [smem:[#allocation41_spill]] %s5520_s0 }
   0x2   :  { %5567 = sst [smem:[#allocation42_spill]] %s5521_s1 }
   0x3   :  { %5568 = sst [smem:[#allocation43_spill]] %s5522_s2 }
   0x4   :  { %5569 = sst [smem:[#allocation44_spill]] %s5523_s3 }
   0x5   :  { %5570 = sst [smem:[#allocation45_spill]] %s5524_s4 }
   0x6   :  { %5571 = sst [smem:[#allocation46_spill]] %s5525_s5 }
   0x7   :  { %5572 = sst [smem:[#allocation47_spill]] %s5526_s6 }
   0x8   :  { %5573 = sst [smem:[#allocation48_spill]] %s5527_s7 }
   0x9   :  { %5574 = sst [smem:[#allocation49_spill]] %s5528_s8 }
   0xa   :  { %5575 = sst [smem:[#allocation50_spill]] %s5529_s9 }
   0xb   :  { %5576 = sst [smem:[#allocation51_spill]] %s5530_s10 }
   0xc   :  { %5577 = sst [smem:[#allocation52_spill]] %s5531_s11 }
   0xd   :  { %5578 = sst [smem:[#allocation53_spill]] %s5532_s12 }
   0xe   :  { %5579 = sst [smem:[#allocation54_spill]] %s5533_s13 }
   0xf   :  { %5580 = sst [smem:[#allocation55_spill]] %s5534_s14 }
  0x10   :  { %19 = vsyncpa [#allocation3], 0 }
  0x11   :  { %21 = vsyncpa [#allocation3 + $0x1], 0 }
  0x12   :  { %22 = vsyncpa [#allocation6], 0 }
  0x13   :  { %24 = vsyncpa [#allocation6 + $0x1], 0 }
  0x14   :  { %25 = vsyncpa [#allocation9], 0 }
  0x15   :  { %27 = vsyncpa [#allocation9 + $0x1], 0 }
  0x16   :  { %28 = vsyncpa [#allocation12], 0 }
  0x17   :  { %30 = vsyncpa [#allocation12 + $0x1], 0 }
  0x18   :  { %31 = vsyncpa [#allocation15], 0 }
  0x19   :  { %33 = vsyncpa [#allocation15 + $0x1], 0 }
  0x1a   :  { %34 = vsyncpa [#allocation4], 0 }
  0x1b   :  { %36 = vsyncpa [#allocation4 + $0x1], 0  ;;  %s4431_s29 = smov 0   ;;  %s4433_s30 = smov 0  }
  0x1c   :  { %s4435_s15 = smov 0   ;;  %s4437_s16 = smov 0  }
  0x1d   :  { %s4439_s17 = smov 0   ;;  %s4441_s18 = smov 0  }
  0x1e   :  { %s4443_s19 = smov 0   ;;  %s4445_s20 = smov 0  }
  0x1f   :  { %s4447_s21 = smov 0   ;;  %s4449_s22 = smov 0  }
  0x20   :  { %s4451_s23 = smov 0  }
  0x21 LB: > { %5581 = sst [smem:[#allocation24_spill]] %s4291_s29  ;;  %s4485_s24 = sadd.s32 4294967295, %s4331_s23   ;;  %s4331_s23 = sphi %s4451_s23, %s42_s23   ;;  %s4327_s22 = sphi %s4449_s22, %s5666_s22   ;;  %s4323_s21 = sphi %s4447_s21, %s5665_s21   ;;  %s4319_s20 = sphi %s4445_s20, %s5664_s20   ;;  %s4315_s19 = sphi %s4443_s19, %s5663_s19   ;;  %s4311_s18 = sphi %s4441_s18, %s5662_s18   ;;  %s4307_s17 = sphi %s4439_s17, %s5661_s17   ;;  %s4303_s16 = sphi %s4437_s16, %s5660_s16   ;;  %s4299_s15 = sphi %s4435_s15, %s5659_s15   ;;  %s4295_s30 = sphi %s4433_s30, %s5658_s30   ;;  %s4291_s29 = sphi %s4431_s29, %s5657_s29  }
  0x22   : > { %5582 = sst [smem:[#allocation25_spill]] %s4295_s30  ;;  %s3170_s25 = sadd.s32 4294967294, %s4331_s23  }
  0x23   : > { %5583 = sst [smem:[#allocation26_spill]] %s4299_s15  ;;  %s51_s26 = sadd.s32 1, %s4323_s21 }
  0x24   : > { %5584 = sst [smem:[#allocation27_spill]] %s4307_s17  ;;  %s54_s27 = sadd.s32 1, %s4327_s22 }
  0x25   : > { %5585 = sst [smem:[#allocation28_spill]] %s4311_s18  ;;  %p52_p0 = scmp.ge.s32.totalorder %s51_s26, 2 }
  0x26   : > { %5586 = sst [smem:[#allocation29_spill]] %s4315_s19  ;;  %s165_s28 = sadd.s32 1, %s4311_s18 }
  0x27   : > { %5587 = sst [smem:[#allocation30_spill]] %s4319_s20  ;;  %p172_p1 = scmp.ne.s32.totalorder %s4311_s18, %s4307_s17 }
  0x28   : > { %5588 = sst [smem:[#allocation31_spill]] %s4323_s21  ;;  %p173_p2 = scmp.eq.s32.totalorder %s4331_s23, 0 }
  0x29   : > { %5589 = sst [smem:[#allocation32_spill]] %s4327_s22  ;;  %s5668_s26 = smov (%p52_p0, %s51_s26), 0 }
  0x2a   : > { %5590 = sst [smem:[#allocation33_spill]] %s4331_s23  ;;  %s5670_s27 = smov (!%p52_p0, %s54_s27), %s4327_s22 }
  0x2b   : > { %5591 = sst [smem:[#allocation34_spill]] %s4485_s24  ;;  %s162_s14 = ssub.s32 %s4323_s21, %s5668_s26 }
  0x2c   : > { %5592 = sst [smem:[#allocation35_spill]] %s5668_s26  ;;  %p4499_p3 = por %p173_p2, %p172_p1 }
  0x2d   : > { %p56_p4 = scmp.ge.s32.totalorder %s5670_s27, 2  ;;  %p163_p5 = scmp.eq.s32.totalorder %s162_s14, 0 }
  0x2e   : > { %p178_p6 = scmp.ne.s32.totalorder %s4307_s17, %s4303_s16  ;;  %p179_p7 = scmp.eq.s32.totalorder %s4485_s24, 0 }
  0x2f   : > { %s5672_s27 = smov (%p56_p4, %s5670_s27), 0  ;;  %s425_s2 = sadd.s32 1, %s4299_s15 }
  0x30   : > { %5594 = sst [smem:[#allocation36_spill]] %s5672_s27  ;;  %p4510_p8 = por %p179_p7, %p178_p6 }
  0x31   : > { %s4508_s3 = scalar_select %p163_p5, %s4311_s18, %s165_s28  }
  0x32   : > { %s5596_s26 = scalar_select %p4510_p8, 1, 0 }
  0x33   : > { %5595 = sst [smem:[#allocation37_spill]] %s4508_s3  ;;  %s422_s1 = ssub.s32 %s4327_s22, %s5672_s27 }
  0x34   : > { %p423_p9 = scmp.eq.s32.totalorder %s422_s1, 0  ;;  %p435_p10 = scmp.ne.s32.totalorder %s4299_s15, %s4295_s30 }
  0x35   : > { %p436_p11 = scmp.eq.s32.totalorder %s4485_s24, 3  ;;  %p441_p13 = scmp.ne.s32.totalorder %s4295_s30, %s4291_s29 }
  0x36   : > { %s4521_s14 = scalar_select %p423_p9, %s4299_s15, %s425_s2  }
  0x37   : > { %p4523_p12 = por %p436_p11, %p435_p10  ;;  %p442_p0 = scmp.eq.s32.totalorder %s3170_s25, 3 }
  0x38   : > { %5597 = sst [smem:[#allocation38_spill]] %s4521_s14  ;;  %p3601_p1 = scmp.lt.s32.totalorder %s4331_s23, 4 }
  0x39   : > { %s5598_s16 = scalar_select %p4523_p12, 1, 0 }
  0x3a   : > { %s4531_s28 = sand.u32 1, %s4311_s18   ;;  %p4533_p2 = por %p442_p0, %p441_p13 }
  0x3b   : > { %5599 = sst [smem:[#allocation39_spill]] %s5598_s16  ;;  %s4538_s1 = sshll.u32 %s4323_s21, 4 }
  0x3c   : > { %s5600_s27 = scalar_select %p4533_p2, 1, 0 }
  0x3d   : > { %p4542_p4 = pnand %p3601_p1, %p4499_p3  ;;  %s4547_s22 = sand.u32 1, %s4331_s23  }
  0x3e   : > { %5601 = sst [smem:[#allocation40_spill]] %s5600_s27  ;;  %s5603_s5 = sld [smem:[#allocation46_spill]] }
  0x3f   : > { %s5602_s2 = scalar_select %p4542_p4, 1, 0 }
  0x40   : > { %s510_s14 = scalar_lea.vmem [#allocation5], %s4531_s28  ;;  %p4565_p7 = pneg %p4542_p4 }
  0x41   : > { %s517_s9 = sshll.u32 %s510_s14, 4  ;;  %s4557_s9 = int_to_ptr.vmem [resolvable:$true] %s517_s9 }
  0x44   : > { %s4553_s18 = scalar_lea.hbm %s5603_s5, %s4538_s1  ;;  %s3928_s14 = scalar_lea.hbm %s5603_s5, 32 }
  0x45   : > { %s3923_s27 = scalar_lea.hbm %s4553_s18, 16  ;;  %p3929_p11 = scmp.lt.u32.totalorder %s4553_s18, %s5603_s5 }
  0x46   : > { %p3924_p6 = scmp.ne.s32.totalorder %s4553_s18, %s3923_s27  ;;  %p3930_p13 = scmp.lt.u32.totalorder %s3928_s14, %s3923_s27 }
  0x47   : > { %p3932_p1 = scmp.lt.u32.totalorder %s3923_s27, %s4553_s18 }
  0x48   : > { %p3926_p9 = pnand %p4565_p7, %p3924_p6  ;;  %p3931_p0 = por %p3930_p13, %p3929_p11 }
  0x4a   : > { %p3927_p10 = pneg %p3926_p9  ;;  %p3933_p5 = por %p3932_p1, %p3931_p0 }
  0x4c   : > { %p3934_p3 = pnand %p3933_p5, %p3927_p10 }
  0x4e   : > { %3937 = shalt.err (!%p3934_p3)
}
  0x4f   : > { %s3938_s15 = scalar_lea.vmem %s4557_s9, 16  ;;  %s4333_s3 = smov [#allocation5]  }
  0x50   : > { %p3939_p6 = scmp.ne.s32.totalorder %s4557_s9, %s3938_s15  ;;  %s3943_s25 = sshll.u32 %s4333_s3, 4  ;;  %s3944_s25 = int_to_ptr.vmem [resolvable:$false] %s3943_s25 }
  0x51   : > { %s3945_s0 = scalar_lea.vmem %s3944_s25, 32  ;;  %p3946_p12 = scmp.lt.s32.totalorder %s4557_s9, %s3944_s25 }
  0x52   : > { %p3941_p9 = pnand %p3939_p6, %p4565_p7  ;;  %p3947_p8 = scmp.lt.s32.totalorder %s3945_s0, %s3938_s15 }
  0x54   : > { %p3942_p2 = pneg %p3941_p9  ;;  %p3948_p11 = por %p3947_p8, %p3946_p12 }
  0x56   : > { %p3949_p13 = pnand %p3948_p11, %p3942_p2 }
  0x58   : > { %3952 = shalt.err (!%p3949_p13)
}
  0x59   : > { %s5605_s27 = scalar_lea.sflag [#allocation6], %s4547_s22  ;;  %p5606_p5 = scmp.lt.s32.totalorder %s4331_s23, 5 }
  0x5a   : > { %3575 = dma.hbm_to_vmem [thread:$0]  (!%p4542_p4), %s4553_s18, 16, %s4557_s9, %s5605_s27  }
  0x5b   : > { %p5607_p3 = scmp.ge.s32.totalorder %s4331_s23, 1  ;;  %s5609_s7 = sld [smem:[#allocation48_spill]] }
  0x5c   : > { %s544_s25 = scalar_lea.vmem [#allocation8], %s4531_s28 }
  0x5d   : > { %p4594_p10 = pnand %p5607_p3, %p5606_p5  ;;  %s551_s0 = sshll.u32 %s544_s25, 4  ;;  %s552_s0 = int_to_ptr.vmem [resolvable:$true] %s551_s0 }
  0x5f   : > { %s5608_s15 = scalar_select %p4594_p10, 1, 0 }
  0x61   : > { %s4602_s3 = scalar_lea.hbm %s5609_s7, %s4538_s1  ;;  %s3958_s16 = scalar_lea.hbm %s5609_s7, 32 }
  0x62   : > { %s3953_s9 = scalar_lea.hbm %s4602_s3, 16  ;;  %p3959_p0 = scmp.lt.u32.totalorder %s4602_s3, %s5609_s7 }
  0x63   : > { %p3954_p8 = scmp.ne.s32.totalorder %s4602_s3, %s3953_s9  ;;  %p3960_p1 = scmp.lt.u32.totalorder %s3958_s16, %s3953_s9 }
  0x64   : > { %p3962_p9 = scmp.lt.u32.totalorder %s3953_s9, %s4602_s3 }
  0x65   : > { %p3956_p12 = pnand %p3954_p8, %p4565_p7  ;;  %p3961_p6 = por %p3960_p1, %p3959_p0 }
  0x67   : > { %p3957_p2 = pneg %p3956_p12  ;;  %p3963_p11 = por %p3962_p9, %p3961_p6 }
  0x69   : > { %p3964_p13 = pnand %p3963_p11, %p3957_p2 }
  0x6b   : > { %3967 = shalt.err (!%p3964_p13)
}
  0x6c   : > { %s3968_s25 = scalar_lea.vmem %s552_s0, 16  ;;  %s4334_s5 = smov [#allocation8]  }
  0x6d   : > { %p3969_p5 = scmp.ne.s32.totalorder %s552_s0, %s3968_s25  ;;  %s3973_s18 = sshll.u32 %s4334_s5, 4  ;;  %s3974_s18 = int_to_ptr.vmem [resolvable:$false] %s3973_s18 }
  0x6e   : > { %s3975_s23 = scalar_lea.vmem %s3974_s18, 32  ;;  %p3976_p12 = scmp.lt.s32.totalorder %s552_s0, %s3974_s18 }
  0x6f   : > { %p3971_p3 = pnand %p3969_p5, %p4565_p7  ;;  %p3977_p10 = scmp.lt.s32.totalorder %s3975_s23, %s3968_s25 }
  0x71   : > { %p3972_p8 = pneg %p3971_p3  ;;  %p3978_p4 = por %p3977_p10, %p3976_p12 }
  0x73   : > { %p3979_p0 = pnand %p3978_p4, %p3972_p8 }
  0x75   : > { %3982 = shalt.err (!%p3979_p0)
}
  0x76   : > { %p5610_p1 = scmp.ne.s32.totalorder %s5602_s2, 0  ;;  %s5611_s19 = scalar_lea.sflag [#allocation9], %s4547_s22 }
  0x77   : > { %s3318_s9 = sshll.u32 %s4323_s21, 10  ;;  %s5612_s5 = sshll.u32 %s4531_s28, 6 }
  0x78   : > { %3581 = dma.hbm_to_vmem [thread:$0]  (!%p5610_p1), %s4602_s3, 16, %s552_s0, %s5611_s19  }
  0x79   : > { %s562_s27 = scalar_lea.vmem [#allocation10], %s5612_s5  ;;  %s5613_s8 = sld [smem:[#allocation49_spill]] }
  0x7a   : > { %s569_s16 = sshll.u32 %s562_s27, 4  ;;  %s5614_s10 = sld [smem:[#allocation51_spill]]  ;;  %s4634_s16 = int_to_ptr.vmem [resolvable:$true] %s569_s16 }
  0x7b   : > { %s5615_s30 = smov %s5612_s5  ;;  %s5556_s19 = scalar_lea.sflag [#allocation12], %s4547_s22 }
  0x7c   : > { %s591_s3 = scalar_lea.vmem [#allocation11], %s5615_s30 }
  0x7d   : > { %s598_s0 = sshll.u32 %s591_s3, 4  ;;  %s4643_s0 = int_to_ptr.vmem [resolvable:$true] %s598_s0 }
  0x7f   : > { %s4632_s25 = scalar_lea.hbm %s5613_s8, %s3318_s9 }
  0x80   : > { %s4639_s20 = scalar_lea.hbm %s5614_s10, %s3318_s9  ;;  %s3988_s7 = scalar_lea.hbm %s5614_s10, 2048 }
  0x81   : > { %s3983_s5 = scalar_lea.hbm %s4639_s20, 1024  ;;  %p3989_p6 = scmp.lt.u32.totalorder %s4639_s20, %s5614_s10 }
  0x82   : > { %p3984_p4 = scmp.ne.s32.totalorder %s4639_s20, %s3983_s5  ;;  %p3990_p9 = scmp.lt.u32.totalorder %s3988_s7, %s3983_s5 }
  0x83   : > { %p3992_p13 = scmp.lt.u32.totalorder %s3983_s5, %s4639_s20 }
  0x84   : > { %p3986_p10 = pnand %p3984_p4, %p4565_p7  ;;  %p3991_p11 = por %p3990_p9, %p3989_p6 }
  0x86   : > { %p3987_p2 = pneg %p3986_p10  ;;  %p3993_p5 = por %p3992_p13, %p3991_p11 }
  0x88   : > { %p3994_p3 = pnand %p3993_p5, %p3987_p2 }
  0x8a   : > { %3997 = shalt.err (!%p3994_p3)
}
  0x8b   : > { %s3998_s30 = scalar_lea.vmem %s4643_s0, 1024  ;;  %s4335_s23 = smov [#allocation11]  }
  0x8c   : > { %p3999_p8 = scmp.ne.s32.totalorder %s4643_s0, %s3998_s30  ;;  %s4003_s3 = sshll.u32 %s4335_s23, 4  ;;  %s4004_s3 = int_to_ptr.vmem [resolvable:$false] %s4003_s3 }
  0x8d   : > { %s4005_s27 = scalar_lea.vmem %s4004_s3, 2048  ;;  %p4006_p4 = scmp.lt.s32.totalorder %s4643_s0, %s4004_s3 }
  0x8e   : > { %p4001_p12 = pnand %p3999_p8, %p4565_p7  ;;  %p4007_p10 = scmp.lt.s32.totalorder %s4005_s27, %s3998_s30 }
  0x90   : > { %p4002_p0 = pneg %p4001_p12  ;;  %p4008_p6 = por %p4007_p10, %p4006_p4 }
  0x92   : > { %p4009_p9 = pnand %p4008_p6, %p4002_p0 }
  0x94   : > { %4012 = shalt.err (!%p4009_p9)
}
  0x95   : > { %s5557_s5 = smov 64   ;;  %s5559_s18 = smov 4  }
  0x96   : > { %3587 = dma.hbm_to_vmem [thread:$0]  (!%p5610_p1), %s4639_s20, 1024, %s4643_s0, %s5556_s19, %s5557_s5, %s5557_s5, %s5559_s18  }
  0x97   : > { %s3184_s7 = sshll.u32 %s4531_s28, 8  ;;  %s3320_s9 = sshll.u32 %s4323_s21, 12 }
  0x98   : > { %s5616_s12 = sld [smem:[#allocation53_spill]]  ;;  %s629_s3 = scalar_lea.vmem [#allocation14], %s3184_s7 }
  0x99   : > { %s636_s27 = sshll.u32 %s629_s3, 4  ;;  %s626_s10 = scalar_lea.sflag [#allocation15], %s4547_s22  ;;  %s4683_s27 = int_to_ptr.vmem [resolvable:$true] %s636_s27 }
  0x9e   : > { %s4679_s23 = scalar_lea.hbm %s5616_s12, %s3320_s9  ;;  %s4018_s14 = scalar_lea.hbm %s5616_s12, 8192 }
  0x9f   : > { %s4013_s24 = scalar_lea.hbm %s4679_s23, 4096  ;;  %p4019_p5 = scmp.lt.u32.totalorder %s4679_s23, %s5616_s12 }
  0xa0   : > { %p4014_p2 = scmp.ne.s32.totalorder %s4679_s23, %s4013_s24  ;;  %p4020_p3 = scmp.lt.u32.totalorder %s4018_s14, %s4013_s24 }
  0xa1   : > { %p4022_p12 = scmp.lt.u32.totalorder %s4013_s24, %s4679_s23 }
  0xa2   : > { %p4016_p11 = pnand %p4014_p2, %p4565_p7  ;;  %p4021_p8 = por %p4020_p3, %p4019_p5 }
  0xa4   : > { %p4017_p13 = pneg %p4016_p11  ;;  %p4023_p0 = por %p4022_p12, %p4021_p8 }
  0xa6   : > { %p4024_p4 = pnand %p4023_p0, %p4017_p13 }
  0xa8   : > { %4027 = shalt.err (!%p4024_p4)
}
  0xa9   : > { %s4028_s3 = scalar_lea.vmem %s4683_s27, 4096  ;;  %s4338_s20 = smov [#allocation14]  }
  0xaa   : > { %p4029_p10 = scmp.ne.s32.totalorder %s4683_s27, %s4028_s3  ;;  %s4033_s0 = sshll.u32 %s4338_s20, 4  ;;  %s4034_s0 = int_to_ptr.vmem [resolvable:$false] %s4033_s0 }
  0xab   : > { %s4035_s19 = scalar_lea.vmem %s4034_s0, 8192  ;;  %p4036_p2 = scmp.lt.s32.totalorder %s4683_s27, %s4034_s0 }
  0xac   : > { %p4031_p6 = pnand %p4029_p10, %p4565_p7  ;;  %p4037_p11 = scmp.lt.s32.totalorder %s4035_s19, %s4028_s3 }
  0xae   : > { %p4032_p9 = pneg %p4031_p6  ;;  %p4038_p5 = por %p4037_p11, %p4036_p2 }
  0xb0   : > { %p4039_p3 = pnand %p4038_p5, %p4032_p9 }
  0xb2   : > { %4042 = shalt.err (!%p4039_p3)
}
  0xb3   : > { %s4339_s24 = smov 256   ;;  %s4340_s14 = smov 16  }
  0xb4   : > { %3593 = dma.hbm_to_vmem [thread:$0]  (!%p5610_p1), %s4679_s23, 4096, %s4683_s27, %s626_s10, %s4339_s24, %s4339_s24, %s4340_s14  }
  0xb5   : > { %s5617_s13 = sld [smem:[#allocation54_spill]]  ;;  %s650_s0 = scalar_lea.vmem [#allocation16], %s3184_s7 }
  0xb6   : > { %s657_s19 = sshll.u32 %s650_s0, 4  ;;  %s5618_s4 = sld [smem:[#allocation45_spill]]  ;;  %s4718_s19 = int_to_ptr.vmem [resolvable:$true] %s657_s19 }
  0xb7   : > { %s493_s23 = scalar_lea.vmem [#allocation2], %s4531_s28  ;;  %s491_s24 = scalar_lea.sflag [#allocation3], %s4531_s28 }
  0xb8   : > { %s500_s27 = sshll.u32 %s493_s23, 4  ;;  %s501_s27 = int_to_ptr.vmem [resolvable:$true] %s500_s27 }
  0xbb   : > { %s4714_s20 = scalar_lea.hbm %s5617_s13, %s3320_s9 }
  0xbc   : > { %s4724_s12 = scalar_lea.hbm %s5618_s4, %s4538_s1  ;;  %s4048_s30 = scalar_lea.hbm %s5618_s4, 32 }
  0xbd   : > { %s4043_s9 = scalar_lea.hbm %s4724_s12, 16  ;;  %p4049_p0 = scmp.lt.u32.totalorder %s4724_s12, %s5618_s4 }
  0xbe   : > { %p4044_p13 = scmp.ne.s32.totalorder %s4724_s12, %s4043_s9  ;;  %p4050_p4 = scmp.lt.u32.totalorder %s4048_s30, %s4043_s9 }
  0xbf   : > { %p4052_p6 = scmp.lt.u32.totalorder %s4043_s9, %s4724_s12 }
  0xc0   : > { %p4046_p8 = pnand %p4044_p13, %p4565_p7  ;;  %p4051_p10 = por %p4050_p4, %p4049_p0 }
  0xc2   : > { %p4047_p12 = pneg %p4046_p8  ;;  %p4053_p9 = por %p4052_p6, %p4051_p10 }
  0xc4   : > { %p4054_p2 = pnand %p4053_p9, %p4047_p12 }
  0xc6   : > { %4057 = shalt.err (!%p4054_p2)
}
  0xc7   : > { %s4058_s3 = scalar_lea.vmem %s501_s27, 16  ;;  %s4341_s0 = smov [#allocation2]  }
  0xc8   : > { %p4059_p11 = scmp.ne.s32.totalorder %s501_s27, %s4058_s3  ;;  %s4063_s23 = sshll.u32 %s4341_s0, 4  ;;  %s4064_s23 = int_to_ptr.vmem [resolvable:$false] %s4063_s23 }
  0xc9   : > { %s4065_s7 = scalar_lea.vmem %s4064_s23, 32  ;;  %p4066_p13 = scmp.lt.s32.totalorder %s501_s27, %s4064_s23 }
  0xca   : > { %p4061_p5 = pnand %p4059_p11, %p4565_p7  ;;  %p4067_p8 = scmp.lt.s32.totalorder %s4065_s7, %s4058_s3 }
  0xcc   : > { %p4062_p3 = pneg %p4061_p5  ;;  %p4068_p1 = por %p4067_p8, %p4066_p13 }
  0xce   : > { %p4069_p0 = pnand %p4068_p1, %p4062_p3 }
  0xd0   : > { %4072 = shalt.err (!%p4069_p0)
}
  0xd1   : > { %p5619_p4 = scmp.ne.s32.totalorder %s5602_s2, 0  ;;  %s5620_s6 = sld [smem:[#allocation47_spill]] }
  0xd2   : > { %s527_s5 = scalar_lea.vmem [#allocation7], %s4531_s28 }
  0xd3   : > { %3572 = dma.hbm_to_vmem [thread:$0]  (!%p5619_p4), %s4724_s12, 16, %s501_s27, %s491_s24  }
  0xd4   : > { %s534_s18 = sshll.u32 %s527_s5, 4  ;;  %s535_s18 = int_to_ptr.vmem [resolvable:$true] %s534_s18 }
  0xd7   : > { %s4749_s30 = scalar_lea.hbm %s5620_s6, %s4538_s1  ;;  %s4078_s12 = scalar_lea.hbm %s5620_s6, 32 }
  0xd8   : > { %s4073_s3 = scalar_lea.hbm %s4749_s30, 16  ;;  %p4079_p6 = scmp.lt.u32.totalorder %s4749_s30, %s5620_s6 }
  0xd9   : > { %p4074_p1 = scmp.ne.s32.totalorder %s4749_s30, %s4073_s3  ;;  %p4080_p9 = scmp.lt.u32.totalorder %s4078_s12, %s4073_s3 }
  0xda   : > { %p4082_p11 = scmp.lt.u32.totalorder %s4073_s3, %s4749_s30 }
  0xdb   : > { %p4076_p12 = pnand %p4074_p1, %p4565_p7  ;;  %p4081_p2 = por %p4080_p9, %p4079_p6 }
  0xdd   : > { %p4077_p10 = pneg %p4076_p12  ;;  %p4083_p5 = por %p4082_p11, %p4081_p2 }
  0xdf   : > { %p4084_p3 = pnand %p4083_p5, %p4077_p10 }
  0xe1   : > { %4087 = shalt.err (!%p4084_p3)
}
  0xe2   : > { %s4088_s7 = scalar_lea.vmem %s535_s18, 16  ;;  %s4342_s9 = smov [#allocation7]  }
  0xe3   : > { %p4089_p13 = scmp.ne.s32.totalorder %s535_s18, %s4088_s7  ;;  %s4093_s14 = sshll.u32 %s4342_s9, 4  ;;  %s4094_s14 = int_to_ptr.vmem [resolvable:$false] %s4093_s14 }
  0xe4   : > { %s4095_s5 = scalar_lea.vmem %s4094_s14, 32  ;;  %p4096_p1 = scmp.lt.s32.totalorder %s535_s18, %s4094_s14 }
  0xe5   : > { %p4091_p8 = pnand %p4089_p13, %p4565_p7  ;;  %p4097_p12 = scmp.lt.s32.totalorder %s4095_s5, %s4088_s7 }
  0xe7   : > { %p4092_p0 = pneg %p4091_p8  ;;  %p4098_p4 = por %p4097_p12, %p4096_p1 }
  0xe9   : > { %p4099_p6 = pnand %p4098_p4, %p4092_p0 }
  0xeb   : > { %4102 = shalt.err (!%p4099_p6)
}
  0xec   : > { %p5621_p9 = scmp.ne.s32.totalorder %s5602_s2, 0  ;;  %s5622_s3 = scalar_lea.sflag [#allocation6], %s4547_s22 }
  0xed   : > { %s4103_s0 = scalar_lea.hbm %s4632_s25, 1024  ;;  %s4108_s27 = scalar_lea.hbm %s5613_s8, 2048 }
  0xee   : > { %3578 = dma.hbm_to_vmem [thread:$0]  (!%p5621_p9), %s4749_s30, 16, %s535_s18, %s5622_s3  }
  0xef   : > { %p4104_p10 = scmp.ne.s32.totalorder %s4632_s25, %s4103_s0  ;;  %p4109_p4 = scmp.lt.u32.totalorder %s4632_s25, %s5613_s8 }
  0xf0   : > { %p4110_p5 = scmp.lt.u32.totalorder %s4108_s27, %s4103_s0  ;;  %p4112_p13 = scmp.lt.u32.totalorder %s4103_s0, %s4632_s25 }
  0xf1   : > { %p4106_p2 = pnand %p4104_p10, %p4565_p7 }
  0xf2   : > { %p4111_p3 = por %p4110_p5, %p4109_p4 }
  0xf3   : > { %p4107_p11 = pneg %p4106_p2 }
  0xf4   : > { %p4113_p8 = por %p4112_p13, %p4111_p3 }
  0xf6   : > { %p4114_p0 = pnand %p4113_p8, %p4107_p11 }
  0xf8   : > { %4117 = shalt.err (!%p4114_p0)
}
  0xf9   : > { %s4118_s30 = scalar_lea.vmem %s4634_s16, 1024  ;;  %s4343_s18 = smov [#allocation10]  }
  0xfa   : > { %p4119_p1 = scmp.ne.s32.totalorder %s4634_s16, %s4118_s30  ;;  %s4123_s9 = sshll.u32 %s4343_s18, 4  ;;  %s4124_s9 = int_to_ptr.vmem [resolvable:$false] %s4123_s9 }
  0xfb   : > { %s4125_s14 = scalar_lea.vmem %s4124_s9, 2048  ;;  %p4126_p10 = scmp.lt.s32.totalorder %s4634_s16, %s4124_s9 }
  0xfc   : > { %p4121_p12 = pnand %p4119_p1, %p4565_p7  ;;  %p4127_p2 = scmp.lt.s32.totalorder %s4125_s14, %s4118_s30 }
  0xfe   : > { %p4122_p6 = pneg %p4121_p12  ;;  %p4128_p4 = por %p4127_p2, %p4126_p10 }
 0x100   : > { %p4129_p5 = pnand %p4128_p4, %p4122_p6 }
 0x102   : > { %4132 = shalt.err (!%p4129_p5)
}
 0x103   : > { %s5623_s5 = smov 4   ;;  %s5624_s3 = smov 64  }
 0x104   : > { %s5625_s0 = scalar_lea.sflag [#allocation9], %s4547_s22  ;;  %s5626_s11 = sld [smem:[#allocation52_spill]] }
 0x105   : > { %3584 = dma.hbm_to_vmem [thread:$0]  (!%p5621_p9), %s4632_s25, 1024, %s4634_s16, %s5625_s0, %s5624_s3, %s5624_s3, %s5623_s5  }
 0x106   : > { %s611_s24 = scalar_lea.vmem [#allocation13], %s4531_s28 }
 0x107   : > { %s618_s7 = sshll.u32 %s611_s24, 4  ;;  %s619_s7 = int_to_ptr.vmem [resolvable:$true] %s618_s7 }
 0x10a   : > { %s4801_s27 = scalar_lea.hbm %s5626_s11, %s4538_s1  ;;  %s4138_s16 = scalar_lea.hbm %s5626_s11, 32 }
 0x10b   : > { %s4133_s30 = scalar_lea.hbm %s4801_s27, 16  ;;  %p4139_p8 = scmp.lt.u32.totalorder %s4801_s27, %s5626_s11 }
 0x10c   : > { %p4134_p11 = scmp.ne.s32.totalorder %s4801_s27, %s4133_s30  ;;  %p4140_p0 = scmp.lt.u32.totalorder %s4138_s16, %s4133_s30 }
 0x10d   : > { %p4142_p12 = scmp.lt.u32.totalorder %s4133_s30, %s4801_s27 }
 0x10e   : > { %p4136_p3 = pnand %p4134_p11, %p4565_p7  ;;  %p4141_p1 = por %p4140_p0, %p4139_p8 }
 0x110   : > { %p4137_p13 = pneg %p4136_p3  ;;  %p4143_p6 = por %p4142_p12, %p4141_p1 }
 0x112   : > { %p4144_p10 = pnand %p4143_p6, %p4137_p13 }
 0x114   : > { %4147 = shalt.err (!%p4144_p10)
}
 0x115   : > { %s4148_s28 = scalar_lea.vmem %s619_s7, 16  ;;  %s4344_s1 = smov [#allocation13]  }
 0x116   : > { %p4149_p2 = scmp.ne.s32.totalorder %s619_s7, %s4148_s28  ;;  %s4153_s0 = sshll.u32 %s4344_s1, 4  ;;  %s4154_s0 = int_to_ptr.vmem [resolvable:$false] %s4153_s0 }
 0x117   : > { %s4155_s23 = scalar_lea.vmem %s4154_s0, 32  ;;  %p4156_p11 = scmp.lt.s32.totalorder %s619_s7, %s4154_s0 }
 0x118   : > { %p4151_p4 = pnand %p4149_p2, %p4565_p7  ;;  %p4157_p3 = scmp.lt.s32.totalorder %s4155_s23, %s4148_s28 }
 0x11a   : > { %p4152_p5 = pneg %p4151_p4  ;;  %p4158_p9 = por %p4157_p3, %p4156_p11 }
 0x11c   : > { %p4159_p0 = pnand %p4158_p9, %p4152_p5 }
 0x11e   : > { %4162 = shalt.err (!%p4159_p0)
}
 0x11f   : > { %p5627_p8 = scmp.ne.s32.totalorder %s5602_s2, 0  ;;  %s5628_s12 = scalar_lea.sflag [#allocation12], %s4547_s22 }
 0x120   : > { %s4163_s24 = scalar_lea.hbm %s4714_s20, 4096  ;;  %s4168_s9 = scalar_lea.hbm %s5617_s13, 8192 }
 0x121   : > { %3590 = dma.hbm_to_vmem [thread:$0]  (!%p5627_p8), %s4801_s27, 16, %s619_s7, %s5628_s12  }
 0x122   : > { %p4164_p13 = scmp.ne.s32.totalorder %s4714_s20, %s4163_s24  ;;  %p4169_p9 = scmp.lt.u32.totalorder %s4714_s20, %s5617_s13 }
 0x123   : > { %p4170_p6 = scmp.lt.u32.totalorder %s4168_s9, %s4163_s24  ;;  %p4172_p2 = scmp.lt.u32.totalorder %s4163_s24, %s4714_s20 }
 0x124   : > { %p4166_p1 = pnand %p4164_p13, %p4565_p7 }
 0x125   : > { %p4171_p10 = por %p4170_p6, %p4169_p9 }
 0x126   : > { %p4167_p12 = pneg %p4166_p1 }
 0x127   : > { %p4173_p4 = por %p4172_p2, %p4171_p10 }
 0x129   : > { %p4174_p5 = pnand %p4173_p4, %p4167_p12 }
 0x12b   : > { %4177 = shalt.err (!%p4174_p5)
}
 0x12c   : > { %s4178_s27 = scalar_lea.vmem %s4718_s19, 4096  ;;  %s4345_s7 = smov [#allocation16]  }
 0x12d   : > { %p4179_p11 = scmp.ne.s32.totalorder %s4718_s19, %s4178_s27  ;;  %s4183_s14 = sshll.u32 %s4345_s7, 4  ;;  %s4184_s14 = int_to_ptr.vmem [resolvable:$false] %s4183_s14 }
 0x12e   : > { %s4185_s28 = scalar_lea.vmem %s4184_s14, 8192  ;;  %p4186_p13 = scmp.lt.s32.totalorder %s4718_s19, %s4184_s14 }
 0x12f   : > { %p4181_p3 = pnand %p4179_p11, %p4565_p7  ;;  %p4187_p1 = scmp.lt.s32.totalorder %s4185_s28, %s4178_s27 }
 0x131   : > { %p4182_p0 = pneg %p4181_p3  ;;  %p4188_p9 = por %p4187_p1, %p4186_p13 }
 0x133   : > { %p4189_p6 = pnand %p4188_p9, %p4182_p0 }
 0x135   : > { %4192 = shalt.err (!%p4189_p6)
}
 0x136   : > { %3596 = dma.hbm_to_vmem [thread:$0]  (!%p5627_p8), %s4714_s20, 4096, %s4718_s19, %s626_s10, %s5624_s3, %s5624_s3, %s5623_s5  }
 0x137   : > { %p5629_p7 = scmp.ne.s32.totalorder %s5608_s15, 0 }
 0x138   : > { %s4852_s29 = sand.u32 (!%p5629_p7), 1, %s4307_s17   ;;  %p5630_p12 = scmp.ne.s32.totalorder (!%p5629_p7), %s5596_s26, 0 }
 0x139   : > { %669 = sbr.rel (%p5629_p7) target bundleno = 4507 (0x119b), region = 76  ;;  %s672_s1 = scalar_lea.sflag (!%p5629_p7), [#allocation3], %s4852_s29 }
 0x140   : > { %4266 = dma.done.wait (%p5630_p12), %s672_s1, 16  }
 0x141   : > { %4268 = vsyncadd (%p5630_p12), %s672_s1, 4294967280  ;;  %s5631_s22 = sld [smem:[#allocation34_spill]] }
 0x147   : > { %s679_s10 = sand.u32 1, %s5631_s22  }
 0x148   : > { %s680_s2 = scalar_lea.sflag [#allocation6], %s679_s10 }
 0x149   : > { %4270 = dma.done.wait (%p5630_p12), %s680_s2, 32  }
 0x14a   : > { %4272 = vsyncadd (%p5630_p12), %s680_s2, 4294967264  ;;  %s696_s19 = scalar_lea.sflag [#allocation9], %s679_s10 }
 0x14b   : > { %4274 = dma.done.wait (%p5630_p12), %s696_s19, 1040  }
 0x14c   : > { %4276 = vsyncadd (%p5630_p12), %s696_s19, 4294966256  ;;  %s3191_s3 = sshll.u32 %s4852_s29, 6  ;;  %s713_s12 = scalar_lea.sflag [#allocation12], %s679_s10 }
 0x14d   : > { %s4873_s23 = scalar_lea.vmem [#allocation10], %s3191_s3  ;;  %s4875_s24 = scalar_lea.vmem [#allocation11], %s3191_s3 }
 0x14e   : > { %4278 = dma.done.wait (%p5630_p12), %s713_s12, 1040  }
 0x14f   : > { %4280 = vsyncadd (%p5630_p12), %s713_s12, 4294966256  ;;  %s3193_s30 = sshll.u32 %s4852_s29, 8  ;;  %s730_s9 = scalar_lea.sflag [#allocation15], %s679_s10 }
 0x150   : > { %s4883_s16 = scalar_lea.vmem [#allocation14], %s3193_s30 }
 0x151   : > { %4282 = dma.done.wait (%p5630_p12), %s730_s9, 8192  }
 0x152   : > { %4284 = vsyncadd (%p5630_p12), %s730_s9, 4294959104  ;;  %s5632_s25 = sld [smem:[#allocation25_spill]]  ;;  %s5633_s27 = sld [smem:[#allocation30_spill]] }
 0x153   : > { %s5634_s7 = sld [smem:[#allocation29_spill]]  ;;  %s5635_s19 = sld [smem:[#allocation41_spill]] }
 0x154   : > { %s5636_s5 = sld [smem:[#allocation43_spill]]  ;;  %s5637_s18 = sld [smem:[#allocation42_spill]] }
 0x155   : > { %s5638_s6 = sld [smem:[#allocation44_spill]]  ;;  %s4918_s10 = scalar_lea.vmem [#allocation16], %s3193_s30 }
 0x158   : > { %s5563_s14 = sand.u32 1, %s5632_s25   ;;  %p843_p8 = scmp.lt.s32.totalorder %s5633_s27, 1 }
 0x159   : > { %s3195_s28 = sshll.u32 %s5563_s14, 4  ;;  %p853_p10 = scmp.lt.s32.totalorder %s5634_s7, 1 }
 0x15a   : > { %s5674_s27 = smov (!%p843_p8, %s5633_s27), 1  ;;  %p3201_p2 = scmp.ne.s32.totalorder %s5634_s7, 0 }
 0x15b   : > { %s4896_s1 = scalar_select %p853_p10, %s5634_s7, 1 }
 0x15c   : > { %s3322_s22 = sshll.u32 %s5674_s27, 4  ;;  %s3548_s26 = smul.u32 20, %s5674_s27 }
 0x15d   : > { %s847_s3 = scalar_lea.vmem %s5635_s19, %s3322_s22  ;;  %s855_s20 = scalar_lea.vmem %s5636_s5, %s4896_s1 }
 0x15e   : > { %s852_s15 = scalar_lea.vmem %s5637_s18, %s3548_s26  ;;  %s858_s8 = scalar_lea.vmem %s5638_s6, %s4896_s1  ;;  %v869_v0 = vld [vmem:[%s847_s3] sm:$0xff] (!%p3201_p2)  ;;  %v870_v1 = vld [vmem:[%s847_s3 + $0x8] sm:$0xff] (!%p3201_p2) }
 0x15f   : > { %s3323_s11 = sshll.u32 %s4896_s1, 7  ;;  %s5639_s27 = sld [smem:[#allocation50_spill]] }
 0x160   : > { %s4920_s22 = scalar_lea.vmem [#allocation17], %s3195_s28  ;;  %868 = sbr.rel (%p3201_p2) target bundleno = 359 (0x167), region = 116 }
 0x161   : > { %871 = vst [vmem:[%s4920_s22] sm:$0xff] (!%p3201_p2), %v869_v0  ;;  %872 = vst [vmem:[%s4920_s22 + $0x8] sm:$0xff] (!%p3201_p2), %v870_v1 }
 0x165   : > { %s4916_s17 = scalar_lea.vmem %s5639_s27, %s3323_s11 }
 0x167 PF: > { %v3326_v2 = vld [vmem:[%s852_s15] sm:$0xff]   ;;  %v3333_v3 = vld [vmem:[%s852_s15 + $0x8] sm:$0xff]   ;;  %v879_v6 = vld [vmem:[%s852_s15 + $0x10] sm:$0x1]  ;;  %v4346_v7 = vmov 0   ;;  %vm937_vm0 = vcmask 1040384  }
 0x168   : > { %v3327_v4 = vunpack.c.l.bf16 %v3326_v2  ;;  %v3331_v5 = vunpack.c.l.bf16 %v3333_v3  ;;  %1246 = vmatprep.mubr.bf16.mxu1 %v4346_v7  ;;  %v3328_v8 = vunpack.c.h.bf16 %v3326_v2  ;;  %v3332_v9 = vunpack.c.h.bf16 %v3333_v3  ;;  %v873_v11 = vld [vmem:[%s4920_s22] sm:$0xff]  ;;  %v874_v13 = vld [vmem:[%s4920_s22 + $0x8] sm:$0xff]  ;;  %s5640_s4 = scalar_lea.vmem [#allocation2], %s4852_s29  ;;  %s5641_s6 = scalar_lea.vmem [#allocation5], %s4852_s29 }
 0x169   : > { %v884_v10 = vunpack.c.l.bf16 %v879_v6  ;;  %v3719_v14 = vld [vmem:[%s4916_s17 + $0x4] ss:$8 sps:$4 sm:$0xff]   ;;  %v3721_v15 = vld [vmem:[%s4916_s17] ss:$8 sps:$4 sm:$0xff]   ;;  %v3722_v16 = vld [vmem:[%s4916_s17 + $0x14] ss:$8 sps:$4 sm:$0xff]  }
 0x16a   : > { %929 = vadd.xlane.f32.xlu0 %v3327_v4  ;;  %933 = vadd.xlane.f32.xlu1 %v3331_v5  ;;  %v3724_v46 = vld [vmem:[%s4916_s17 + $0x10] ss:$8 sps:$4 sm:$0xff]   ;;  %v3725_v47 = vld [vmem:[%s4916_s17 + $0x24] ss:$8 sps:$4 sm:$0xff]   ;;  %v3727_v48 = vld [vmem:[%s4916_s17 + $0x20] ss:$8 sps:$4 sm:$0xff]  }
 0x16b   : > { %v938_v12 = vsel %vm937_vm0, %v884_v10, 0.0  ;;  %1214 = vmatprep.subr.bf16.mxu1 %v3719_v14  ;;  %v3728_v49 = vld [vmem:[%s4873_s23] sm:$0xff]   ;;  %v4347_v50 = vmov 0.0   ;;  %v3729_v51 = vld [vmem:[%s4916_s17 + $0x34] ss:$8 sps:$4 sm:$0xff]   ;;  %v3740_v59 = vld [vmem:[%s4873_s23 + $0x18] sm:$0xff]  }
 0x16c   : > { %1215 = vmatpush1.bf16.msra.mxu1 %v3721_v15  ;;  %3428 = vmatprep.subr.bf16.mxu0 %v4347_v50  ;;  %v3731_v52 = vld [vmem:[%s4916_s17 + $0x30] ss:$8 sps:$4 sm:$0xff]   ;;  %v3733_v54 = vld [vmem:[%s4916_s17 + $0x44] ss:$8 sps:$4 sm:$0xff]   ;;  %v3735_v55 = vld [vmem:[%s4916_s17 + $0x40] ss:$8 sps:$4 sm:$0xff]  }
 0x16d   : > { %1216 = vmatprep.subr.bf16.mxu1 %v3722_v16  ;;  %3429 = vmatpush3.bf16.msra.mxu0 %v3728_v49  ;;  %v3732_v53 = vld [vmem:[%s4873_s23 + $0x8] sm:$0xff]   ;;  %v3736_v56 = vld [vmem:[%s4873_s23 + $0x10] sm:$0xff]   ;;  %v3741_v60 = vld [vmem:[%s4916_s17 + $0x64] ss:$8 sps:$4 sm:$0xff]   ;;  %vm4348_vm1 = vmmov 0   ;;  %vm1281_vm2 = vcmask 261120  }
 0x16e   : > { %931 = vadd.xlane.f32.xlu0 %v3328_v8  ;;  %935 = vadd.xlane.f32.xlu1 %v3332_v9  ;;  %v3737_v57 = vld [vmem:[%s4916_s17 + $0x54] ss:$8 sps:$4 sm:$0xff]   ;;  %v3739_v58 = vld [vmem:[%s4916_s17 + $0x50] ss:$8 sps:$4 sm:$0xff]   ;;  %v3743_v61 = vld [vmem:[%s4916_s17 + $0x60] ss:$8 sps:$4 sm:$0xff]  }
 0x16f   : > { %3430 = vmatprep.subr.bf16.mxu0 %v4347_v50  ;;  %v3744_v62 = vld [vmem:[%s4873_s23 + $0x20] sm:$0xff]   ;;  %v3745_v63 = vld [vmem:[%s4916_s17 + $0x74] ss:$8 sps:$4 sm:$0xff]   ;;  %v3747_v0 = vld [vmem:[%s4916_s17 + $0x70] ss:$8 sps:$4 sm:$0xff]   ;;  %3444 = vmatprep.mubr.msk.bf16.mxu0 %vm4348_vm1, %v4347_v50  ;;  %vm1335_vm3 = vcmask 269312  }
 0x170   : > { %1217 = vmatpush1.bf16.msra.mxu1 %v3724_v46  ;;  %v3748_v1 = vld [vmem:[%s4873_s23 + $0x28] sm:$0xff]   ;;  %v3749_v2 = vld [vmem:[%s4873_s23 + $0x30] sm:$0xff]   ;;  %v3750_v3 = vld [vmem:[%s4873_s23 + $0x38] sm:$0xff]   ;;  %s4351_s5 = smov 32   ;;  %vm1858_vm4 = vcmask 523264   ;;  %vm1861_vm5 = vcmask 785408  }
 0x171   : > { %1218 = vmatprep.subr.bf16.mxu1 %v3725_v47  ;;  %3431 = vmatpush3.bf16.msra.mxu0 %v3732_v53  ;;  %s5644_s23 = scalar_lea.vmem [#allocation13], %s4852_s29  ;;  %s5646_s30 = scalar_lea.vmem [#allocation8], %s4852_s29 }
 0x172   : > { %939 = vadd.xlane.f32.xlu0 %v938_v12  ;;  %887 = vadd.xlane.f32.xlu1 %v873_v11  ;;  %s5648_s18 = sld [smem:[#allocation25_spill]]  ;;  %s2874_s14 = sshll.u32 %s4920_s22, 4  ;;  %s5452_s14 = int_to_ptr.vmem [resolvable:$true] %s2874_s14 }
 0x173   : > { %3432 = vmatprep.subr.bf16.mxu0 %v4347_v50  ;;  %s5650_s26 = sld [smem:[#allocation55_spill]]  ;;  %s4193_s12 = scalar_lea.vmem %s5452_s14, 256 }
 0x174   : > { %1219 = vmatpush1.bf16.msra.mxu1 %v3727_v48  ;;  %p4194_p4 = scmp.ne.s32.totalorder %s5452_s14, %s4193_s12  ;;  %s4353_s9 = smov [#allocation17]  }
 0x175   : > { %1220 = vmatprep.subr.bf16.mxu1 %v3729_v51  ;;  %3433 = vmatpush3.bf16.msra.mxu0 %v3736_v56  ;;  %s4197_s25 = sshll.u32 %s4353_s9, 4  ;;  %s4198_s25 = int_to_ptr.vmem [resolvable:$false] %s4197_s25 }
 0x176   : > { %889 = vadd.xlane.f32.xlu0 %v874_v13  ;;  %3434 = vmatprep.subr.bf16.mxu0 %v4347_v50  ;;  %s4199_s27 = scalar_lea.vmem %s4198_s25, 512  ;;  %p4200_p0 = scmp.lt.s32.totalorder %s5452_s14, %s4198_s25 }
 0x177   : > { %p4201_p13 = scmp.lt.s32.totalorder %s4199_s27, %s4193_s12 }
 0x178   : > { %1221 = vmatpush1.bf16.msra.mxu1 %v3731_v52  ;;  %s5651_s19 = sand.u32 1, %s5648_s18  }
 0x179   : > { %1222 = vmatprep.subr.bf16.mxu1 %v3733_v54  ;;  %3435 = vmatpush3.bf16.msra.mxu0 %v3740_v59  ;;  %s5459_s3 = scalar_lea.sflag [#allocation4], %s5651_s19  ;;  %p4202_p1 = por %p4201_p13, %p4200_p0 }
 0x17a   : > { %3436 = vmatprep.subr.bf16.mxu0 %v4347_v50 }
 0x17c   : > { %1223 = vmatpush1.bf16.msra.mxu1 %v3735_v55 }
 0x17d   : > { %1224 = vmatprep.subr.bf16.mxu1 %v3737_v57  ;;  %3437 = vmatpush3.bf16.msra.mxu0 %v3744_v62 }
 0x17e   : > { %3438 = vmatprep.subr.bf16.mxu0 %v4347_v50 }
 0x180   : > { %1225 = vmatpush1.bf16.msra.mxu1 %v3739_v58 }
 0x181   : > { %1226 = vmatprep.subr.bf16.mxu1 %v3741_v60  ;;  %3439 = vmatpush3.bf16.msra.mxu0 %v3748_v1 }
 0x182   : > { %3440 = vmatprep.subr.bf16.mxu0 %v4347_v50 }
 0x184   : > { %1227 = vmatpush1.bf16.msra.mxu1 %v3743_v61 }
 0x185   : > { %1228 = vmatprep.subr.bf16.mxu1 %v3745_v63  ;;  %3441 = vmatpush3.bf16.msra.mxu0 %v3749_v2 }
 0x186   : > { %3442 = vmatprep.subr.bf16.mxu0 %v4347_v50 }
 0x188   : > { %1229 = vmatpush1.bf16.msra.mxu1 %v3747_v0 }
 0x189   : > { %3478 = vmatprep.subr.bf16.mxu1 %v4347_v50  ;;  %3443 = vmatpush3.bf16.msra.mxu0 %v3750_v3 }
 0x18a   : > { %3448 = vmatprep.subr.bf16.mxu0 %v4347_v50 }
 0x1f7   : > { %v930_v17 = vpop.xlane.xlu0 %929  ;;  %v934_v18 = vpop.xlane.xlu1 %933 }
 0x1f8   : > { %v941_v19 = vmul.f32 0.0078125, %v930_v17  ;;  %v943_v20 = vmul.f32 0.0078125, %v934_v18 }
 0x1fa   : > { %v4932_v21 = vsub.f32 %v3327_v4, %v941_v19  ;;  %v4934_v22 = vsub.f32 %v3331_v5, %v943_v20 }
 0x1fb   : > { %v932_v23 = vpop.xlane.xlu0 %931  ;;  %v936_v24 = vpop.xlane.xlu1 %935 }
 0x1fc   : > { %v942_v25 = vmul.f32 0.0078125, %v932_v23  ;;  %v951_v26 = vmul.f32 %v4932_v21, %v4932_v21  ;;  %v944_v27 = vmul.f32 0.0078125, %v936_v24  ;;  %v953_v30 = vmul.f32 %v4934_v22, %v4934_v22 }
 0x1fe   : > { %v4938_v28 = vsub.f32 %v3328_v8, %v942_v25  ;;  %956 = vadd.xlane.f32.xlu1 %v951_v26  ;;  %v4940_v29 = vsub.f32 %v3332_v9, %v944_v27 }
 0x1ff   : > { %v940_v31 = vpop.xlane.xlu0 %939  ;;  %v888_v32 = vpop.xlane.xlu1 %887 }
 0x200   : > { %v945_v33 = vmul.f32 0.0078125, %v940_v31  ;;  %v952_v34 = vmul.f32 %v4938_v28, %v4938_v28  ;;  %v892_v35 = vmul.f32 0.0078125, %v888_v32  ;;  %v954_v38 = vmul.f32 %v4940_v29, %v4940_v29  ;;  %v3204_v32 = vld [vmem:[%s5640_s4] ss:$0 sm:$0xff] }
 0x202   : > { %v4946_v36 = vsub.f32 %v884_v10, %v945_v33  ;;  %958 = vadd.xlane.f32.xlu0 %v952_v34  ;;  %960 = vadd.xlane.f32.xlu1 %v953_v30  ;;  %v4948_v37 = vsub.f32 %v873_v11, %v892_v35 }
 0x203   : > { %v890_v39 = vpop.xlane.xlu0 %889 }
 0x204   : > { %v893_v40 = vmul.f32 0.0078125, %v890_v39  ;;  %v955_v41 = vmul.f32 %v4946_v36, %v4946_v36  ;;  %v896_v44 = vmul.f32 %v4948_v37, %v4948_v37  ;;  %v3205_v39 = vld [vmem:[%s5641_s6] ss:$0 sm:$0xff] }
 0x206   : > { %v4954_v42 = vsub.f32 %v874_v13, %v893_v40  ;;  %962 = vadd.xlane.f32.xlu0 %v954_v38  ;;  %v964_v43 = vsel %vm937_vm0, %v955_v41, 0.0 }
 0x207   : > { %965 = vadd.xlane.f32.xlu1 %v964_v43 }
 0x208   : > { %v897_v45 = vmul.f32 %v4954_v42, %v4954_v42 }
 0x20a   : > { %898 = vadd.xlane.f32.xlu0 %v896_v44 }
 0x20b   : > { %900 = vadd.xlane.f32.xlu1 %v897_v45 }
 0x28b   : > { %v957_v4 = vpop.xlane.xlu1 %956 }
 0x28c   : > { %v967_v5 = vmul.f32 0.0078125, %v957_v4 }
 0x28e   : > { %v972_v6 = vadd.f32 1e-05, %v967_v5 }
 0x28f   : > { %v959_v8 = vpop.xlane.xlu0 %958  ;;  %v961_v9 = vpop.xlane.xlu1 %960 }
 0x290   : > { %3839 = vrsqrt.f32 %v972_v6  ;;  %v968_v10 = vmul.f32 0.0078125, %v959_v8  ;;  %v969_v11 = vmul.f32 0.0078125, %v961_v9 }
 0x292   : > { %v973_v12 = vadd.f32 1e-05, %v968_v10  ;;  %v974_v13 = vadd.f32 1e-05, %v969_v11 }
 0x293   : > { %v963_v14 = vpop.xlane.xlu0 %962 }
 0x294   : > { %3841 = vrsqrt.f32 %v973_v12  ;;  %v970_v15 = vmul.f32 0.0078125, %v963_v14  ;;  %v966_v16 = vpop.xlane.xlu1 %965 }
 0x295   : > { %v971_v17 = vmul.f32 0.0078125, %v966_v16  ;;  %3843 = vrsqrt.f32 %v974_v13 }
 0x296   : > { %v975_v18 = vadd.f32 1e-05, %v970_v15 }
 0x297   : > { %v976_v19 = vadd.f32 1e-05, %v971_v17  ;;  %v899_v20 = vpop.xlane.xlu0 %898 }
 0x298   : > { %3845 = vrsqrt.f32 %v975_v18  ;;  %v902_v23 = vmul.f32 0.0078125, %v899_v20  ;;  %v901_v24 = vpop.xlane.xlu1 %900 }
 0x299   : > { %v903_v25 = vmul.f32 0.0078125, %v901_v24  ;;  %3847 = vrsqrt.f32 %v976_v19 }
 0x29a   : > { %v3840_v26 = vpop.eup %3839  ;;  %v904_v27 = vadd.f32 1e-05, %v902_v23 }
 0x29b   : > { %v905_v30 = vadd.f32 1e-05, %v903_v25  ;;  %v982_v31 = vmul.f32 %v3840_v26, %v4932_v21 }
 0x29c   : > { %3849 = vrsqrt.f32 %v904_v27 }
 0x29d   : > { %3851 = vrsqrt.f32 %v905_v30  ;;  %v993_v35 = vmul.f32 %v3204_v32, %v982_v31  ;;  %v5052_v30 = vsel %vm937_vm0, 65535, %v4346_v7 }
 0x29e   : > { %v3842_v33 = vpop.eup %3841 }
 0x29f   : > { %v983_v34 = vmul.f32 %v3842_v33, %v4938_v28  ;;  %v3844_v38 = vpop.eup %3843  ;;  %v1004_v43 = vadd.f32 %v3205_v39, %v993_v35  ;;  %v3202_v28 = vld [vmem:[%s855_s20] ss:$0 sm:$0xff]  ;;  %s4350_s20 = smov 64  }
 0x2a0   : > { %v984_v45 = vmul.f32 %v3844_v38, %v4934_v22  ;;  %v3203_v22 = vld [vmem:[%s858_s8] ss:$0 sm:$0xff]  ;;  %s4349_s8 = smov 96  }
 0x2a1   : > { %v994_v40 = vmul.f32 %v3204_v32, %v983_v34 }
 0x2a2   : > { %v3846_v41 = vpop.eup %3845  ;;  %v995_v52 = vmul.f32 %v3204_v32, %v984_v45 }
 0x2a3   : > { %v1005_v44 = vadd.f32 %v3205_v39, %v994_v40  ;;  %v985_v21 = vmul.f32 %v3846_v41, %v4940_v29  ;;  %v3848_v46 = vpop.eup %3847 }
 0x2a4   : > { %v986_v56 = vmul.f32 %v3848_v46, %v4946_v36  ;;  %v1006_v58 = vadd.f32 %v3205_v39, %v995_v52 }
 0x2a5   : > { %v1009_v47 = vpack.c.bf16 %v1005_v44, %v1004_v43  ;;  %v996_v48 = vmul.f32 %v3204_v32, %v985_v21 }
 0x2a6   : > { %v3850_v49 = vpop.eup %3849  ;;  %v997_v62 = vmul.f32 %v3204_v32, %v986_v56 }
 0x2a7   : > { %v3852_v51 = vpop.eup %3851  ;;  %1247 = vmatmul.mubr.bf16.vlgmr.msra.gmra.mrb[0].mxu1 %v1009_v47  ;;  %v908_v53 = vmul.f32 %v3850_v49, %v4948_v37  ;;  %v1007_v54 = vadd.f32 %v3205_v39, %v996_v48 }
 0x2a8   : > { %1256 = vmatprep.mubr.bf16.mxu1 %v4346_v7  ;;  %v909_v29 = vmul.f32 %v3852_v51, %v4954_v42  ;;  %v1008_v63 = vadd.f32 %v3205_v39, %v997_v62 }
 0x2a9   : > { %v916_v55 = vmul.f32 %v3202_v28, %v908_v53  ;;  %v1010_v61 = vpack.c.bf16 %v1007_v54, %v1006_v58 }
 0x2aa   : > { %v917_v57 = vmul.f32 %v3202_v28, %v909_v29  ;;  %v1011_v42 = vpack.c.bf16 %v1008_v63, %v1008_v63 }
 0x2ab   : > { %v924_v59 = vadd.f32 %v3203_v22, %v916_v55 }
 0x2ac   : > { %v925_v60 = vadd.f32 %v3203_v22, %v917_v57 }
 0x2ae   : > { %v926_v37 = vpack.c.bf16 %v925_v60, %v924_v59 }
 0x2af   : > { %1257 = vmatmul.mubr.bf16.gmra.mrb[4].mxu1 %v1010_v61 }
 0x2b0   : > { %3445 = vmatmul.mubr.bf16.vlgmr.msra.gmra.mrb[0].mxu0 %v926_v37  ;;  %1266 = vmatprep.mubr.bf16.mxu1 %v4346_v7 }
 0x2b1   : > { %3454 = vmatprep.mubr.msk.bf16.mxu0 %vm4348_vm1, %v4347_v50 }
 0x2b7   : > { %1267 = vmatmul.mubr.bf16.gmra.mrb[8].mxu1 %v1011_v42 }
 0x2b8   : > { %3484 = vmatprep.mubr.msk.bf16.mxu1 %vm4348_vm1, %v4347_v50 }
 0x37a   : > { %v1248_v36 = vpop.f32.mrb[0].mxu1 }
 0x37b   : > { %v1250_v0 = vpop.f32.mrb[1].mxu1 }
 0x37c   : > { %v1252_v1 = vpop.f32.mrb[2].mxu1 }
 0x37d   : > { %v5021_v2 = vpack.c.bf16 %v1252_v1, %v1248_v36  ;;  %v1254_v3 = vpop.f32.mrb[3].mxu1 }
 0x37e   : > { %v5023_v4 = vpack.c.bf16 %v1254_v3, %v1250_v0 }
 0x37f   : > { %v1286_v5 = vsel %vm1281_vm2, %v5021_v2, 0 }
 0x380   : > { %3449 = vmatpush3.bf16.xpose.msra.mxu0 %v1286_v5 }
 0x381   : > { %3450 = vmatprep.subr.bf16.mxu0 %v4347_v50 }
 0x382   : > { %v1258_v6 = vpop.f32.mrb[4].mxu1 }
 0x383   : > { %v1110_v8 = vpop.f32.mrb[0].mxu0  ;;  %v1260_v9 = vpop.f32.mrb[5].mxu1 }
 0x384   : > { %v3446_v10 = vpop.f32.mrb[1].mxu0  ;;  %v1262_v11 = vpop.f32.mrb[6].mxu1 }
 0x385   : > { %v5028_v12 = vpack.c.bf16 %v1262_v11, %v1258_v6  ;;  %v1113_v13 = vpop.f32.mrb[2].mxu0  ;;  %v1264_v14 = vpop.f32.mrb[7].mxu1 }
 0x386   : > { %v5030_v15 = vpack.c.bf16 %v1113_v13, %v1110_v8  ;;  %v5032_v16 = vpack.c.bf16 %v1264_v14, %v1260_v9  ;;  %v3447_v17 = vpop.f32.mrb[3].mxu0 }
 0x387   : > { %v1289_v18 = vsel %vm1281_vm2, %v5028_v12, 0 }
 0x388   : > { %3451 = vmatpush3.bf16.xpose.msra.mxu0 %v1289_v18 }
 0x389   : > { %3452 = vmatprep.subr.bf16.mxu0 %v4347_v50 }
 0x38a   : > { %v1268_v19 = vpop.f32.mrb[8].mxu1 }
 0x38b   : > { %v5037_v20 = vpack.c.bf16 %v1268_v19, %v1268_v19  ;;  %v1270_v23 = vpop.f32.mrb[9].mxu1 }
 0x38c   : > { %v1272_v24 = vpop.f32.mrb[10].mxu1  ;;  %v5048_v27 = vpack.c.bf16 %v1270_v23, %v1270_v23 }
 0x38d   : > { %v1273_v25 = vpop.f32.mrb[11].mxu1  ;;  %v1292_v26 = vsel %vm1281_vm2, %v5037_v20, 0 }
 0x38e   : > { %v1365_v31 = vand.u32 %v5052_v30, %v5048_v27 }
 0x390   : > { %3453 = vmatpush3.bf16.xpose.msra.mxu0 %v1292_v26 }
 0x391   : > { %3458 = vmatprep.subr.bf16.mxu0 %v4347_v50 }
 0x397   : > { %3455 = vmatmul.mubr.msk.bf16.vlgmr.msra.gmra.mrb[4].mxu0 %vm1281_vm2, %v5030_v15 }
 0x398   : > { %3459 = vmatpush3.bf16.msra.mxu0 %v5023_v4  ;;  %3464 = vmatprep.mubr.msk.bf16.mxu0 %vm4348_vm1, %v4347_v50 }
 0x399   : > { %3460 = vmatprep.subr.bf16.mxu0 %v4347_v50 }
 0x39c   : > { %3461 = vmatpush3.bf16.msra.mxu0 %v5032_v16 }
 0x39d   : > { %3462 = vmatprep.subr.bf16.mxu0 %v4347_v50 }
 0x3a0   : > { %3463 = vmatpush3.bf16.msra.mxu0 %v1365_v31 }
 0x3a1   : > { %3468 = vmatprep.subr.bf16.mxu0 %v4347_v50 }
 0x46a   : > { %v1328_v32 = vpop.f32.mrb[4].mxu0 }
 0x46b   : > { %v3456_v33 = vpop.f32.mrb[5].mxu0  ;;  %v1336_v34 = vsel %vm1335_vm3, %v1328_v32, -inf }
 0x46c   : > { %1337 = vmax.xlane.f32.xlu0 %v1336_v34  ;;  %v1331_v35 = vpop.f32.mrb[6].mxu0 }
 0x46d   : > { %v3457_v38 = vpop.f32.mrb[7].mxu0  ;;  %v1339_v39 = vsel %vm1335_vm3, %v1331_v35, -inf }
 0x46e   : > { %1340 = vmax.xlane.f32.xlu1 %v1339_v39 }
 0x4f9   : > { %v1338_v40 = vpop.xlane.xlu0 %1337 }
 0x4fa   : > { %v1342_v41 = vsub.f32 %v1328_v32, %v1338_v40 }
 0x4fb   : > { %v1341_v43 = vpop.xlane.xlu1 %1340 }
 0x4fc   : > { %v1344_v44 = vmul.f32 1.442695, %v1342_v41  ;;  %v1343_v45 = vsub.f32 %v1331_v35, %v1341_v43 }
 0x4fe   : > { %3853 = vpow2.f32 %v1344_v44  ;;  %v1346_v21 = vmul.f32 1.442695, %v1343_v45 }
 0x500   : > { %3855 = vpow2.f32 %v1346_v21 }
 0x508   : > { %v3854_v46 = vpop.eup %3853 }
 0x509   : > { %v1348_v47 = vsel %vm1335_vm3, %v3854_v46, 0.0 }
 0x50a   : > { %v3856_v48 = vpop.eup %3855  ;;  %1349 = vadd.xlane.f32.xlu0 %v1348_v47 }
 0x50b   : > { %v1351_v49 = vsel %vm1335_vm3, %v3856_v48, 0.0 }
 0x50c   : > { %1352 = vadd.xlane.f32.xlu1 %v1351_v49 }
 0x51d   : > { %1416 = vrot.lane.b32.xlu1 %v5028_v12, %s4349_s8 }
 0x520   : > { %1414 = vrot.lane.b32.xlu0 %v5021_v2, %s4349_s8 }
 0x521   : > { %1418 = vrot.lane.b32.xlu1 %v5037_v20, %s4349_s8 }
 0x525   : > { %1409 = vrot.lane.b32.xlu1 %v5030_v15, %s4349_s8 }
 0x597   : > { %v1350_v28 = vpop.xlane.xlu0 %1349 }
 0x598   : > { %3857 = vrcp.f32 %v1350_v28 }
 0x599   : > { %v1353_v51 = vpop.xlane.xlu1 %1352 }
 0x59a   : > { %3859 = vrcp.f32 %v1353_v51 }
 0x59b   : > { %v1415_v54 = vpop.permute.xlu0 %1414 }
 0x59c   : > { %v1424_v56 = vsel %vm1281_vm2, %v1415_v54, 0 }
 0x59d   : > { %v1417_v57 = vpop.permute.xlu1 %1416 }
 0x59e   : > { %v1427_v58 = vsel %vm1281_vm2, %v1417_v57, 0 }
 0x5a1   : > { %v1419_v59 = vpop.permute.xlu1 %1418 }
 0x5a2   : > { %v3858_v52 = vpop.eup %3857  ;;  %v1430_v60 = vsel %vm1281_vm2, %v1419_v59, 0 }
 0x5a3   : > { %v1356_v22 = vmul.f32 %v3858_v52, %v3854_v46 }
 0x5a4   : > { %v3860_v53 = vpop.eup %3859 }
 0x5a5   : > { %v1357_v29 = vmul.f32 %v3860_v53, %v3856_v48  ;;  %v1410_v61 = vpop.permute.xlu1 %1409 }
 0x5a7   : > { %v1358_v55 = vpack.c.bf16 %v1357_v29, %v1356_v22 }
 0x5a9   : > { %3465 = vmatmul.mubr.msk.bf16.vlgmr.msra.gmra.mrb[8].mxu0 %vm1335_vm3, %v1358_v55 }
 0x5aa   : > { %3469 = vmatpush3.bf16.xpose.msra.mxu0 %v1424_v56  ;;  %3474 = vmatprep.mubr.msk.bf16.mxu0 %vm4348_vm1, %v4347_v50 }
 0x5ab   : > { %3470 = vmatprep.subr.bf16.mxu0 %v4347_v50 }
 0x5b2   : > { %3471 = vmatpush3.bf16.xpose.msra.mxu0 %v1427_v58 }
 0x5b3   : > { %3472 = vmatprep.subr.bf16.mxu0 %v4347_v50 }
 0x5ba   : > { %3473 = vmatpush3.bf16.xpose.msra.mxu0 %v1430_v60 }
 0x5bb   : > { %3498 = vmatprep.subr.bf16.mxu0 %v4347_v50 }
 0x5c1   : > { %3475 = vmatmul.mubr.msk.bf16.vlgmr.msra.gmra.mrb[12].mxu0 %vm1281_vm2, %v1410_v61 }
 0x5c2   : > { %3504 = vmatprep.mubr.msk.bf16.mxu0 %vm4348_vm1, %v4347_v50 }
 0x67c   : > { %v5083_v62 = vpop.f32.mrb[8].mxu0 }
 0x67d   : > { %v3466_v37 = vpop.f32.mrb[9].mxu0 }
 0x67e   : > { %v5085_v63 = vpop.f32.mrb[10].mxu0 }
 0x67f   : > { %v3467_v42 = vpop.f32.mrb[11].mxu0 }
 0x694   : > { %v1466_v36 = vpop.f32.mrb[12].mxu0 }
 0x695   : > { %v3476_v0 = vpop.f32.mrb[13].mxu0  ;;  %v1473_v1 = vsel %vm1335_vm3, %v1466_v36, -inf }
 0x696   : > { %1474 = vmax.xlane.f32.xlu0 %v1473_v1  ;;  %v1469_v3 = vpop.f32.mrb[14].mxu0 }
 0x697   : > { %v3477_v5 = vpop.f32.mrb[15].mxu0  ;;  %v1476_v6 = vsel %vm1335_vm3, %v1469_v3, -inf }
 0x698   : > { %1477 = vmax.xlane.f32.xlu1 %v1476_v6 }
 0x6a9   : > { %1501 = vrot.lane.b32.xlu1 %v5032_v16, %s4349_s8 }
 0x6ad   : > { %1503 = vrot.lane.b32.xlu1 %v5048_v27, %s4349_s8 }
 0x6b1   : > { %1556 = vrot.lane.b32.xlu1 %v5021_v2, %s4350_s20 }
 0x6b5   : > { %1560 = vrot.lane.b32.xlu1 %v5037_v20, %s4350_s20 }
 0x723   : > { %v1475_v8 = vpop.xlane.xlu0 %1474 }
 0x724   : > { %v1479_v9 = vsub.f32 %v1466_v36, %v1475_v8 }
 0x725   : > { %v1478_v10 = vpop.xlane.xlu1 %1477 }
 0x726   : > { %v1481_v11 = vmul.f32 1.442695, %v1479_v9  ;;  %v1480_v13 = vsub.f32 %v1469_v3, %v1478_v10 }
 0x728   : > { %3861 = vpow2.f32 %v1481_v11  ;;  %v1483_v14 = vmul.f32 1.442695, %v1480_v13 }
 0x729   : > { %v1502_v26 = vpop.permute.xlu1 %1501 }
 0x72a   : > { %3863 = vpow2.f32 %v1483_v14 }
 0x72d   : > { %v1504_v32 = vpop.permute.xlu1 %1503 }
 0x72e   : > { %v1511_v35 = vand.u32 %v1504_v32, %v5052_v30 }
 0x731   : > { %v1557_v41 = vpop.permute.xlu1 %1556 }
 0x732   : > { %v3862_v17 = vpop.eup %3861  ;;  %v1566_v43 = vsel %vm1281_vm2, %v1557_v41, 0 }
 0x733   : > { %v1485_v18 = vsel %vm1335_vm3, %v3862_v17, 0.0 }
 0x734   : > { %v3864_v19 = vpop.eup %3863  ;;  %1486 = vadd.xlane.f32.xlu0 %v1485_v18 }
 0x735   : > { %v1488_v23 = vsel %vm1335_vm3, %v3864_v19, 0.0  ;;  %v1561_v21 = vpop.permute.xlu1 %1560 }
 0x736   : > { %v1572_v46 = vsel %vm1281_vm2, %v1561_v21, 0 }
 0x738   : > { %1489 = vadd.xlane.f32.xlu0 %v1488_v23 }
 0x74e   : > { %1499 = vrot.lane.b32.xlu0 %v5023_v4, %s4349_s8 }
 0x752   : > { %1558 = vrot.lane.b32.xlu0 %v5028_v12, %s4350_s20 }
 0x756   : > { %1554 = vrot.lane.b32.xlu0 %v5030_v15, %s4350_s20 }
 0x7c1   : > { %v1487_v24 = vpop.xlane.xlu0 %1486 }
 0x7c2   : > { %3865 = vrcp.f32 %v1487_v24 }
 0x7c5   : > { %v1490_v25 = vpop.xlane.xlu0 %1489 }
 0x7c6   : > { %3867 = vrcp.f32 %v1490_v25 }
 0x7c9   : > { %v1500_v31 = vpop.permute.xlu0 %1499 }
 0x7ca   : > { %3479 = vmatpush3.bf16.msra.mxu1 %v1500_v31 }
 0x7cb   : > { %3480 = vmatprep.subr.bf16.mxu1 %v4347_v50 }
 0x7cc   : > { %v3866_v33 = vpop.eup %3865 }
 0x7cd   : > { %v1493_v38 = vmul.f32 %v3866_v33, %v3862_v17  ;;  %v1559_v44 = vpop.permute.xlu0 %1558 }
 0x7ce   : > { %3481 = vmatpush3.bf16.msra.mxu1 %v1502_v26  ;;  %v1569_v45 = vsel %vm1281_vm2, %v1559_v44, 0 }
 0x7cf   : > { %3482 = vmatprep.subr.bf16.mxu1 %v4347_v50 }
 0x7d0   : > { %v3868_v34 = vpop.eup %3867 }
 0x7d1   : > { %v1494_v39 = vmul.f32 %v3868_v34, %v3864_v19  ;;  %v1555_v47 = vpop.permute.xlu0 %1554 }
 0x7d2   : > { %3483 = vmatpush3.bf16.msra.mxu1 %v1511_v35 }
 0x7d3   : > { %v1495_v40 = vpack.c.bf16 %v1494_v39, %v1493_v38  ;;  %3488 = vmatprep.subr.bf16.mxu1 %v4347_v50 }
 0x7d5   : > { %3485 = vmatmul.mubr.msk.bf16.vlgmr.msra.gmra.mrb[12].mxu1 %vm1335_vm3, %v1495_v40 }
 0x7d6   : > { %3494 = vmatprep.mubr.msk.bf16.mxu1 %vm4348_vm1, %v4347_v50 }
 0x7db   : > { %3489 = vmatpush3.bf16.xpose.msra.mxu1 %v1566_v43 }
 0x7dc   : > { %3490 = vmatprep.subr.bf16.mxu1 %v4347_v50 }
 0x7e3   : > { %3491 = vmatpush3.bf16.xpose.msra.mxu1 %v1569_v45 }
 0x7e4   : > { %3492 = vmatprep.subr.bf16.mxu1 %v4347_v50 }
 0x7eb   : > { %3493 = vmatpush3.bf16.xpose.msra.mxu1 %v1572_v46 }
 0x7ec   : > { %3518 = vmatprep.subr.bf16.mxu1 %v4347_v50 }
 0x7f2   : > { %3495 = vmatmul.mubr.msk.bf16.vlgmr.msra.gmra.mrb[16].mxu1 %vm1281_vm2, %v1555_v47 }
 0x7f3   : > { %3524 = vmatprep.mubr.msk.bf16.mxu1 %vm4348_vm1, %v4347_v50 }
 0x8a8   : > { %v5121_v48 = vpop.f32.mrb[12].mxu1 }
 0x8a9   : > { %v3486_v49 = vpop.f32.mrb[13].mxu1 }
 0x8aa   : > { %v5123_v28 = vpop.f32.mrb[14].mxu1 }
 0x8ab   : > { %v3704_v51 = vpack.i.bf16 %v5123_v28, %v5121_v48  ;;  %v3487_v52 = vpop.f32.mrb[15].mxu1 }
 0x8c5   : > { %v1608_v53 = vpop.f32.mrb[16].mxu1 }
 0x8c6   : > { %v3496_v22 = vpop.f32.mrb[17].mxu1  ;;  %v1615_v29 = vsel %vm1335_vm3, %v1608_v53, -inf }
 0x8c7   : > { %1616 = vmax.xlane.f32.xlu1 %v1615_v29  ;;  %v1611_v54 = vpop.f32.mrb[18].mxu1 }
 0x8c8   : > { %v3497_v55 = vpop.f32.mrb[19].mxu1  ;;  %v1618_v56 = vsel %vm1335_vm3, %v1611_v54, -inf }
 0x8c9   : > { %1619 = vmax.xlane.f32.xlu0 %v1618_v56 }
 0x8d8   : > { %1638 = vrot.lane.b32.xlu1 %v5023_v4, %s4350_s20 }
 0x8dc   : > { %1642 = vrot.lane.b32.xlu1 %v5048_v27, %s4350_s20 }
 0x8e0   : > { %1695 = vrot.lane.b32.xlu1 %v5021_v2, %s4351_s5 }
 0x8e4   : > { %1697 = vrot.lane.b32.xlu1 %v5028_v12, %s4351_s5 }
 0x8e8   : > { %1693 = vrot.lane.b32.xlu1 %v5030_v15, %s4351_s5 }
 0x954   : > { %v1617_v57 = vpop.xlane.xlu1 %1616 }
 0x955   : > { %v1621_v58 = vsub.f32 %v1608_v53, %v1617_v57 }
 0x956   : > { %v1620_v59 = vpop.xlane.xlu0 %1619 }
 0x957   : > { %v1623_v60 = vmul.f32 1.442695, %v1621_v58  ;;  %v1622_v61 = vsub.f32 %v1611_v54, %v1620_v59  ;;  %v3751_v58 = vld [vmem:[%s4875_s24] sm:$0xff]   ;;  %v3752_v59 = vld [vmem:[%s4875_s24 + $0x8] sm:$0xff]  }
 0x958   : > { %v1639_v37 = vpop.permute.xlu1 %1638 }
 0x959   : > { %3869 = vpow2.f32 %v1623_v60  ;;  %v1625_v42 = vmul.f32 1.442695, %v1622_v61  ;;  %3499 = vmatpush3.bf16.msra.mxu0 %v1639_v37  ;;  %v3754_v60 = vld [vmem:[%s4875_s24 + $0x18] sm:$0xff]   ;;  %v3755_v61 = vld [vmem:[%s4875_s24 + $0x20] sm:$0xff]   ;;  %v3756_v37 = vld [vmem:[%s4875_s24 + $0x28] sm:$0xff]  }
 0x95a   : > { %3500 = vmatprep.subr.bf16.mxu0 %v4347_v50 }
 0x95b   : > { %3871 = vpow2.f32 %v1625_v42  ;;  %v3757_v42 = vld [vmem:[%s4875_s24 + $0x30] sm:$0xff]  }
 0x95c   : > { %v1643_v3 = vpop.permute.xlu1 %1642 }
 0x95d   : > { %v1650_v6 = vand.u32 %v1643_v3, %v5052_v30 }
 0x960   : > { %v1696_v13 = vpop.permute.xlu1 %1695 }
 0x961   : > { %v1705_v14 = vsel %vm1281_vm2, %v1696_v13, 0 }
 0x963   : > { %v3870_v36 = vpop.eup %3869 }
 0x964   : > { %v1627_v2 = vsel %vm1335_vm3, %v3870_v36, 0.0  ;;  %v1698_v17 = vpop.permute.xlu1 %1697 }
 0x965   : > { %v3872_v0 = vpop.eup %3871  ;;  %1628 = vadd.xlane.f32.xlu0 %v1627_v2  ;;  %v1708_v18 = vsel %vm1281_vm2, %v1698_v17, 0 }
 0x966   : > { %v1630_v12 = vsel %vm1335_vm3, %v3872_v0, 0.0 }
 0x968   : > { %v1694_v24 = vpop.permute.xlu1 %1693 }
 0x969   : > { %1631 = vadd.xlane.f32.xlu0 %v1630_v12 }
 0x97f   : > { %1640 = vrot.lane.b32.xlu0 %v5032_v16, %s4350_s20 }
 0x983   : > { %1699 = vrot.lane.b32.xlu0 %v5037_v20, %s4351_s5 }
 0x9f2   : > { %v1629_v15 = vpop.xlane.xlu0 %1628 }
 0x9f3   : > { %3873 = vrcp.f32 %v1629_v15 }
 0x9f6   : > { %v1632_v1 = vpop.xlane.xlu0 %1631 }
 0x9f7   : > { %3875 = vrcp.f32 %v1632_v1 }
 0x9fa   : > { %v1641_v5 = vpop.permute.xlu0 %1640 }
 0x9fb   : > { %3501 = vmatpush3.bf16.msra.mxu0 %v1641_v5 }
 0x9fc   : > { %3502 = vmatprep.subr.bf16.mxu0 %v4347_v50 }
 0x9fd   : > { %v3874_v8 = vpop.eup %3873 }
 0x9fe   : > { %v1635_v10 = vmul.f32 %v3874_v8, %v3870_v36  ;;  %v1700_v19 = vpop.permute.xlu0 %1699  ;;  %v3758_v36 = vld [vmem:[%s4875_s24 + $0x38] sm:$0xff]  }
 0x9ff   : > { %3503 = vmatpush3.bf16.msra.mxu0 %v1650_v6  ;;  %v1711_v23 = vsel %vm1281_vm2, %v1700_v19, 0 }
 0xa00   : > { %3508 = vmatprep.subr.bf16.mxu0 %v4347_v50 }
 0xa01   : > { %v3876_v9 = vpop.eup %3875 }
 0xa02   : > { %v1636_v11 = vmul.f32 %v3876_v9, %v3872_v0 }
 0xa04   : > { %v1637_v20 = vpack.c.bf16 %v1636_v11, %v1635_v10 }
 0xa06   : > { %3505 = vmatmul.mubr.msk.bf16.vlgmr.msra.gmra.mrb[16].mxu0 %vm1335_vm3, %v1637_v20 }
 0xa07   : > { %3514 = vmatprep.mubr.msk.bf16.mxu0 %vm4348_vm1, %v4347_v50 }
 0xa08   : > { %3509 = vmatpush3.bf16.xpose.msra.mxu0 %v1705_v14 }
 0xa09   : > { %3510 = vmatprep.subr.bf16.mxu0 %v4347_v50 }
 0xa10   : > { %3511 = vmatpush3.bf16.xpose.msra.mxu0 %v1708_v18 }
 0xa11   : > { %3512 = vmatprep.subr.bf16.mxu0 %v4347_v50 }
 0xa18   : > { %3513 = vmatpush3.bf16.xpose.msra.mxu0 %v1711_v23 }
 0xa1f   : > { %3515 = vmatmul.mubr.msk.bf16.vlgmr.msra.gmra.mrb[20].mxu0 %vm1281_vm2, %v1694_v24 }
 0xa20   : > { %2244 = vmatprep.mubr.bf16.mxu0 %v4346_v7 }
 0xad9   : > { %v1686_v25 = vpop.f32.mrb[16].mxu0 }
 0xada   : > { %v3506_v26 = vpop.f32.mrb[17].mxu0 }
 0xadb   : > { %v1689_v31 = vpop.f32.mrb[18].mxu0 }
 0xadc   : > { %v3709_v32 = vpack.i.bf16 %v1689_v31, %v1686_v25  ;;  %v3507_v33 = vpop.f32.mrb[19].mxu0 }
 0xaf2   : > { %v1747_v34 = vpop.f32.mrb[20].mxu0 }
 0xaf3   : > { %v3516_v35 = vpop.f32.mrb[21].mxu0  ;;  %v1754_v38 = vsel %vm1335_vm3, %v1747_v34, -inf }
 0xaf4   : > { %1755 = vmax.xlane.f32.xlu0 %v1754_v38  ;;  %v1750_v39 = vpop.f32.mrb[22].mxu0  ;;  %v3922_v38 = vld [vmem:[%s4920_s22 + $0x8] sm:$0xff] }
 0xaf5   : > { %v3517_v40 = vpop.f32.mrb[23].mxu0  ;;  %v1757_v41 = vsel %vm1335_vm3, %v1750_v39, -inf }
 0xaf6   : > { %1758 = vmax.xlane.f32.xlu1 %v1757_v41  ;;  %v3761_v40 = vld [vmem:[%s4883_s16 + $0x4] ss:$16 sps:$4 sm:$0xff]   ;;  %v3762_v41 = vld [vmem:[%s4883_s16 + $0x8] ss:$16 sps:$4 sm:$0xff]  }
 0xaf7   : > { %2212 = vmatprep.subr.bf16.mxu0 %v3761_v40  ;;  %v3813_v40 = vld [vmem:[%s4918_s10 + $0x8] sm:$0xff]  }
 0xb07   : > { %1779 = vrot.lane.b32.xlu1 %v5032_v16, %s4351_s5 }
 0xb0b   : > { %1781 = vrot.lane.b32.xlu1 %v5048_v27, %s4351_s5 }
 0xb0f   : > { %3705 = vrot.lane.b32.xlu1 %v3704_v51, %s4351_s5 }
 0xb81   : > { %v1756_v43 = vpop.xlane.xlu0 %1755 }
 0xb82   : > { %v1760_v44 = vsub.f32 %v1747_v34, %v1756_v43  ;;  %v3764_v43 = vld [vmem:[%s4883_s16 + $0xc] ss:$16 sps:$4 sm:$0xff]  }
 0xb83   : > { %v1759_v45 = vpop.xlane.xlu1 %1758 }
 0xb84   : > { %v1762_v21 = vmul.f32 1.442695, %v1760_v44  ;;  %v1761_v46 = vsub.f32 %v1750_v39, %v1759_v45  ;;  %v3767_v44 = vld [vmem:[%s4883_s16 + $0x24] ss:$16 sps:$4 sm:$0xff]   ;;  %v3770_v45 = vld [vmem:[%s4883_s16 + $0x2c] ss:$16 sps:$4 sm:$0xff]  }
 0xb86   : > { %3877 = vpow2.f32 %v1762_v21  ;;  %v1764_v47 = vmul.f32 1.442695, %v1761_v46  ;;  %v3765_v21 = vld [vmem:[%s4883_s16 + $0x20] ss:$16 sps:$4 sm:$0xff]   ;;  %v3768_v46 = vld [vmem:[%s4883_s16 + $0x28] ss:$16 sps:$4 sm:$0xff]  }
 0xb87   : > { %v1780_v51 = vpop.permute.xlu1 %1779 }
 0xb88   : > { %3879 = vpow2.f32 %v1764_v47 }
 0xb8b   : > { %v1782_v22 = vpop.permute.xlu1 %1781 }
 0xb8c   : > { %v1789_v54 = vand.u32 %v1782_v22, %v5052_v30  ;;  %v3753_v30 = vld [vmem:[%s4875_s24 + $0x10] sm:$0xff]   ;;  %s5645_s24 = scalar_lea.vmem [#allocation7], %s4852_s29  ;;  %s5647_s29 = sld [smem:[#allocation30_spill]] }
 0xb8d   : > { %v3776_v22 = vld [vmem:[%s4883_s16 + $0x4c] ss:$16 sps:$4 sm:$0xff]  }
 0xb8f   : > { %v3706_v3 = vpop.permute.xlu1 %3705 }
 0xb90   : > { %v3878_v49 = vpop.eup %3877  ;;  %v3708_v6 = vunpack.i.h.bf16 %v3706_v3  ;;  %v3707_v8 = vunpack.i.l.bf16 %v3706_v3  ;;  %v3801_v3 = vld [vmem:[%s4883_s16 + $0xe0] ss:$16 sps:$4 sm:$0xff]  }
 0xb91   : > { %v1766_v52 = vsel %vm1335_vm3, %v3878_v49, 0.0 }
 0xb92   : > { %v3880_v16 = vpop.eup %3879  ;;  %1767 = vadd.xlane.f32.xlu0 %v1766_v52  ;;  %v1856_v13 = vsel %vm1281_vm2, %v5083_v62, %v3707_v8  ;;  %s3324_s7 = sshll.u32 %s5647_s29, 8 }
 0xb93   : > { %v1769_v27 = vsel %vm1335_vm3, %v3880_v16, 0.0  ;;  %s5450_s2 = scalar_lea.hbm %s5650_s26, %s3324_s7 }
 0xb96   : > { %1770 = vadd.xlane.f32.xlu0 %v1769_v27 }
 0xbac   : > { %1777 = vrot.lane.b32.xlu0 %v5023_v4, %s4351_s5 }
 0xbb0   : > { %3710 = vrot.lane.b32.xlu0 %v3709_v32, %s4350_s20  ;;  %v3921_v32 = vld [vmem:[%s4920_s22] sm:$0xff] }
 0xc1f   : > { %v1768_v48 = vpop.xlane.xlu0 %1767 }
 0xc20   : > { %3881 = vrcp.f32 %v1768_v48 }
 0xc23   : > { %v1771_v28 = vpop.xlane.xlu0 %1770 }
 0xc24   : > { %3883 = vrcp.f32 %v1771_v28 }
 0xc27   : > { %v1778_v53 = vpop.permute.xlu0 %1777 }
 0xc28   : > { %3519 = vmatpush3.bf16.msra.mxu1 %v1778_v53  ;;  %v3773_v53 = vld [vmem:[%s4883_s16 + $0x44] ss:$16 sps:$4 sm:$0xff]  }
 0xc29   : > { %3520 = vmatprep.subr.bf16.mxu1 %v4347_v50 }
 0xc2a   : > { %v3882_v29 = vpop.eup %3881 }
 0xc2b   : > { %v1774_v55 = vmul.f32 %v3882_v29, %v3878_v49  ;;  %v3711_v5 = vpop.permute.xlu0 %3710  ;;  %v3771_v29 = vld [vmem:[%s4883_s16 + $0x40] ss:$16 sps:$4 sm:$0xff]  }
 0xc2c   : > { %3521 = vmatpush3.bf16.msra.mxu1 %v1780_v51  ;;  %v3713_v9 = vunpack.i.h.bf16 %v3711_v5  ;;  %v3712_v10 = vunpack.i.l.bf16 %v3711_v5  ;;  %v3804_v5 = vld [vmem:[%s4883_s16 + $0xe8] ss:$16 sps:$4 sm:$0xff]  }
 0xc2d   : > { %3522 = vmatprep.subr.bf16.mxu1 %v4347_v50 }
 0xc2e   : > { %v3884_v4 = vpop.eup %3883  ;;  %v1859_v17 = vsel %vm1858_vm4, %v1856_v13, %v3712_v10 }
 0xc2f   : > { %v1775_v56 = vmul.f32 %v3884_v4, %v3880_v16  ;;  %v3774_v4 = vld [vmem:[%s4883_s16 + $0x48] ss:$16 sps:$4 sm:$0xff]  }
 0xc30   : > { %3523 = vmatpush3.bf16.msra.mxu1 %v1789_v54  ;;  %v3779_v54 = vld [vmem:[%s4883_s16 + $0x64] ss:$16 sps:$4 sm:$0xff]  }
 0xc31   : > { %v1776_v57 = vpack.c.bf16 %v1775_v56, %v1774_v55  ;;  %3528 = vmatprep.subr.bf16.mxu1 %v4347_v50  ;;  %v3782_v55 = vld [vmem:[%s4883_s16 + $0x6c] ss:$16 sps:$4 sm:$0xff]   ;;  %v3777_v56 = vld [vmem:[%s4883_s16 + $0x60] ss:$16 sps:$4 sm:$0xff]  }
 0xc33   : > { %3525 = vmatmul.mubr.msk.bf16.vlgmr.msra.gmra.mrb[20].mxu1 %vm1335_vm3, %v1776_v57  ;;  %v3780_v57 = vld [vmem:[%s4883_s16 + $0x68] ss:$16 sps:$4 sm:$0xff]  }
 0xc34   : > { %3544 = vmatprep.mubr.msk.bf16.mxu1 %vm4348_vm1, %v4347_v50  ;;  %3529 = vmatpush3.bf16.msra.mxu1 %v3751_v58  ;;  %v3785_v58 = vld [vmem:[%s4883_s16 + $0x84] ss:$16 sps:$4 sm:$0xff]  }
 0xc35   : > { %3530 = vmatprep.subr.bf16.mxu1 %v4347_v50 }
 0xc38   : > { %3531 = vmatpush3.bf16.msra.mxu1 %v3752_v59  ;;  %v3788_v59 = vld [vmem:[%s4883_s16 + $0x8c] ss:$16 sps:$4 sm:$0xff]  }
 0xc39   : > { %3532 = vmatprep.subr.bf16.mxu1 %v4347_v50 }
 0xc3c   : > { %3533 = vmatpush3.bf16.msra.mxu1 %v3753_v30  ;;  %v3783_v30 = vld [vmem:[%s4883_s16 + $0x80] ss:$16 sps:$4 sm:$0xff]  }
 0xc3d   : > { %3534 = vmatprep.subr.bf16.mxu1 %v4347_v50 }
 0xc40   : > { %3535 = vmatpush3.bf16.msra.mxu1 %v3754_v60  ;;  %v3786_v60 = vld [vmem:[%s4883_s16 + $0x88] ss:$16 sps:$4 sm:$0xff]  }
 0xc41   : > { %3536 = vmatprep.subr.bf16.mxu1 %v4347_v50 }
 0xc44   : > { %3537 = vmatpush3.bf16.msra.mxu1 %v3755_v61  ;;  %v3791_v61 = vld [vmem:[%s4883_s16 + $0xa4] ss:$16 sps:$4 sm:$0xff]  }
 0xc45   : > { %3538 = vmatprep.subr.bf16.mxu1 %v4347_v50 }
 0xc48   : > { %3539 = vmatpush3.bf16.msra.mxu1 %v3756_v37  ;;  %v3794_v37 = vld [vmem:[%s4883_s16 + $0xac] ss:$16 sps:$4 sm:$0xff]  }
 0xc49   : > { %3540 = vmatprep.subr.bf16.mxu1 %v4347_v50 }
 0xc4c   : > { %3541 = vmatpush3.bf16.msra.mxu1 %v3757_v42  ;;  %v3789_v42 = vld [vmem:[%s4883_s16 + $0xa0] ss:$16 sps:$4 sm:$0xff]  }
 0xc4d   : > { %3542 = vmatprep.subr.bf16.mxu1 %v4347_v50  ;;  %v1857_v50 = vsel %vm1281_vm2, %v5085_v63, %v3708_v6  ;;  %v3238_v63 = vld [vmem:[%s5644_s23] ss:$0 sm:$0xff]  ;;  %v3806_v6 = vld [vmem:[%s4883_s16 + $0xec] ss:$16 sps:$4 sm:$0xff]  }
 0xc4e   : > { %v1860_v18 = vsel %vm1858_vm4, %v1857_v50, %v3713_v9 }
 0xc50   : > { %3543 = vmatpush3.bf16.msra.mxu1 %v3758_v36  ;;  %v3792_v36 = vld [vmem:[%s4883_s16 + $0xa8] ss:$16 sps:$4 sm:$0xff]  }
 0xc51   : > { %2255 = vmatprep.subr.bf16.mxu1 %v3764_v43  ;;  %v3815_v43 = vld [vmem:[%s4918_s10 + $0x50] sm:$0xff]  }
 0xd06   : > { %v1825_v2 = vpop.f32.mrb[20].mxu1 }
 0xd07   : > { %v3526_v0 = vpop.f32.mrb[21].mxu1 }
 0xd08   : > { %v1828_v12 = vpop.f32.mrb[22].mxu1  ;;  %v3800_v0 = vld [vmem:[%s4883_s16 + $0xcc] ss:$16 sps:$4 sm:$0xff]  }
 0xd09   : > { %v3714_v15 = vpack.i.bf16 %v1828_v12, %v1825_v2  ;;  %v3527_v1 = vpop.f32.mrb[23].mxu1  ;;  %v3797_v2 = vld [vmem:[%s4883_s16 + $0xc4] ss:$16 sps:$4 sm:$0xff]   ;;  %v3795_v12 = vld [vmem:[%s4883_s16 + $0xc0] ss:$16 sps:$4 sm:$0xff]  }
 0xd0a   : > { %v3803_v1 = vld [vmem:[%s4883_s16 + $0xe4] ss:$16 sps:$4 sm:$0xff]  }
 0xd0b   : > { %3715 = vrot.lane.b32.xlu1 %v3714_v15, %s4349_s8  ;;  %v3798_v15 = vld [vmem:[%s4883_s16 + $0xc8] ss:$16 sps:$4 sm:$0xff]  }
 0xd7d   : > { %v3716_v11 = vpop.permute.xlu1 %3715 }
 0xd7e   : > { %v3718_v20 = vunpack.i.h.bf16 %v3716_v11  ;;  %v3717_v14 = vunpack.i.l.bf16 %v3716_v11 }
 0xd80   : > { %v1862_v19 = vsel %vm1861_vm5, %v1859_v17, %v3717_v14  ;;  %v1863_v23 = vsel %vm1861_vm5, %v1860_v18, %v3718_v20  ;;  %v3247_v17 = vld [vmem:[%s5645_s24] ss:$0 sm:$0xff] }
 0xd81   : > { %v1864_v24 = vpack.c.bf16 %v1863_v23, %v1862_v19 }
 0xd83   : > { %3545 = vmatmul.mubr.bf16.vlgmr.msra.gmra.mrb[24].mxu1 %v1864_v24  ;;  %v3248_v24 = vld [vmem:[%s5646_s30] ss:$0 sm:$0xff] }
 0xd84   : > { %2287 = vmatprep.mubr.bf16.mxu1 %v4346_v7  ;;  %v3759_v7 = vld [vmem:[%s4883_s16] ss:$16 sps:$4 sm:$0xff]   ;;  %2256 = vmatpush1.bf16.msra.mxu1 %v3762_v41  ;;  %v3814_v41 = vld [vmem:[%s4918_s10 + $0x88] sm:$0xff]   ;;  %s5649_s16 = sld [smem:[#allocation39_spill]] }
 0xd85   : > { %2213 = vmatpush1.bf16.msra.mxu0 %v3759_v7  ;;  %2257 = vmatprep.subr.bf16.mxu1 %v3770_v45  ;;  %v3812_v7 = vld [vmem:[%s4918_s10 + $0xc8] sm:$0xff]   ;;  %v3817_v45 = vld [vmem:[%s4918_s10 + $0x10] sm:$0xff]  }
 0xd86   : > { %2214 = vmatprep.subr.bf16.mxu0 %v3767_v44  ;;  %v3816_v44 = vld [vmem:[%s4918_s10 + $0xd0] sm:$0xff]  }
 0xd88   : > { %2258 = vmatpush1.bf16.msra.mxu1 %v3768_v46  ;;  %v3819_v46 = vld [vmem:[%s4918_s10 + $0x58] sm:$0xff]  }
 0xd89   : > { %2215 = vmatpush1.bf16.msra.mxu0 %v3765_v21  ;;  %2259 = vmatprep.subr.bf16.mxu1 %v3776_v22  ;;  %v3818_v21 = vld [vmem:[%s4918_s10 + $0x90] sm:$0xff]   ;;  %v3829_v22 = vld [vmem:[%s4918_s10 + $0x28] sm:$0xff]  }
 0xd8a   : > { %2216 = vmatprep.subr.bf16.mxu0 %v3773_v53  ;;  %v3828_v53 = vld [vmem:[%s4918_s10 + $0xe8] sm:$0xff]   ;;  %p5652_p5 = scmp.ne.s32.totalorder %s5649_s16, 0 }
 0xd8c   : > { %2260 = vmatpush1.bf16.msra.mxu1 %v3774_v4  ;;  %v3831_v4 = vld [vmem:[%s4918_s10 + $0x70] sm:$0xff]   ;;  %p4195_p11 = pnand %p4194_p4, %p5652_p5 }
 0xd8d   : > { %2217 = vmatpush1.bf16.msra.mxu0 %v3771_v29  ;;  %2261 = vmatprep.subr.bf16.mxu1 %v3782_v55  ;;  %v3830_v29 = vld [vmem:[%s4918_s10 + $0xa8] sm:$0xff]   ;;  %v3833_v55 = vld [vmem:[%s4918_s10 + $0x30] sm:$0xff]  }
 0xd8e   : > { %2218 = vmatprep.subr.bf16.mxu0 %v3779_v54  ;;  %v3832_v54 = vld [vmem:[%s4918_s10 + $0xf0] sm:$0xff]   ;;  %p4196_p3 = pneg %p4195_p11 }
 0xd90   : > { %2262 = vmatpush1.bf16.msra.mxu1 %v3780_v57  ;;  %v3835_v57 = vld [vmem:[%s4918_s10 + $0x78] sm:$0xff]   ;;  %p4203_p9 = pnand %p4202_p1, %p4196_p3 }
 0xd91   : > { %2219 = vmatpush1.bf16.msra.mxu0 %v3777_v56  ;;  %2263 = vmatprep.subr.bf16.mxu1 %v3788_v59  ;;  %v3834_v56 = vld [vmem:[%s4918_s10 + $0xb0] sm:$0xff]   ;;  %v3837_v59 = vld [vmem:[%s4918_s10 + $0x38] sm:$0xff]  }
 0xd92   : > { %2220 = vmatprep.subr.bf16.mxu0 %v3785_v58  ;;  %v3836_v58 = vld [vmem:[%s4918_s10 + $0xf8] sm:$0xff]  }
 0xd94   : > { %2264 = vmatpush1.bf16.msra.mxu1 %v3786_v60 }
 0xd95   : > { %2221 = vmatpush1.bf16.msra.mxu0 %v3783_v30  ;;  %2265 = vmatprep.subr.bf16.mxu1 %v3794_v37  ;;  %v3838_v30 = vld [vmem:[%s4918_s10 + $0xb8] sm:$0xff]  }
 0xd96   : > { %2222 = vmatprep.subr.bf16.mxu0 %v3791_v61 }
 0xd98   : > { %2266 = vmatpush1.bf16.msra.mxu1 %v3792_v36 }
 0xd99   : > { %2223 = vmatpush1.bf16.msra.mxu0 %v3789_v42  ;;  %2267 = vmatprep.subr.bf16.mxu1 %v3800_v0 }
 0xd9a   : > { %2224 = vmatprep.subr.bf16.mxu0 %v3797_v2 }
 0xd9c   : > { %2268 = vmatpush1.bf16.msra.mxu1 %v3798_v15 }
 0xd9d   : > { %2225 = vmatpush1.bf16.msra.mxu0 %v3795_v12  ;;  %2269 = vmatprep.subr.bf16.mxu1 %v3806_v6 }
 0xd9e   : > { %2226 = vmatprep.subr.bf16.mxu0 %v3803_v1 }
 0xda0   : > { %2270 = vmatpush1.bf16.msra.mxu1 %v3804_v5 }
 0xda1   : > { %2227 = vmatpush1.bf16.msra.mxu0 %v3801_v3 }
 0xe56   : > { %v1970_v25 = vpop.f32.mrb[24].mxu1 }
 0xe57   : > { %v1971_v62 = vadd.f32 %v3238_v63, %v1970_v25  ;;  %v3546_v26 = vpop.f32.mrb[25].mxu1 }
 0xe58   : > { %v1973_v31 = vpop.f32.mrb[26].mxu1 }
 0xe59   : > { %v5205_v33 = vadd.f32 %v3921_v32, %v1971_v62  ;;  %v1974_v34 = vadd.f32 %v3238_v63, %v1973_v31  ;;  %v3547_v35 = vpop.f32.mrb[27].mxu1  ;;  %v3807_v31 = vld [vmem:[%s4918_s10 + $0x40] sm:$0xff]  }
 0xe5a   : > { %v3808_v32 = vld [vmem:[%s4918_s10 + $0xc0] sm:$0xff]   ;;  %3384 = vmatprep.subr.bf16.mxu0 %v3807_v31 }
 0xe5b   : > { %v5208_v39 = vadd.f32 %v3922_v38, %v1974_v34  ;;  %1981 = vadd.xlane.f32.xlu0 %v5205_v33  ;;  %v3809_v34 = vld [vmem:[%s4918_s10] sm:$0xff]   ;;  %3406 = vmatprep.subr.bf16.mxu1 %v3808_v32  ;;  %v3811_v38 = vld [vmem:[%s4918_s10 + $0x48] sm:$0xff]  }
 0xe5c   : > { %v3810_v35 = vld [vmem:[%s4918_s10 + $0x80] sm:$0xff]  }
 0xe5d   : > { %1983 = vadd.xlane.f32.xlu1 %v5208_v39 }
 0xee8   : > { %v1982_v47 = vpop.xlane.xlu0 %1981 }
 0xee9   : > { %v1985_v49 = vmul.f32 0.0078125, %v1982_v47  ;;  %v3820_v47 = vld [vmem:[%s4918_s10 + $0xd8] sm:$0xff]  }
 0xeea   : > { %v1984_v52 = vpop.xlane.xlu1 %1983 }
 0xeeb   : > { %v5221_v16 = vsub.f32 %v5205_v33, %v1985_v49  ;;  %v1986_v27 = vmul.f32 0.0078125, %v1984_v52  ;;  %v3821_v49 = vld [vmem:[%s4918_s10 + $0x18] sm:$0xff]  }
 0xeec   : > { %v3822_v52 = vld [vmem:[%s4918_s10 + $0x98] sm:$0xff]  }
 0xeed   : > { %v5224_v48 = vsub.f32 %v5208_v39, %v1986_v27  ;;  %v1989_v28 = vmul.f32 %v5221_v16, %v5221_v16  ;;  %v3824_v27 = vld [vmem:[%s4918_s10 + $0xe0] sm:$0xff]  }
 0xeef   : > { %1991 = vadd.xlane.f32.xlu0 %v1989_v28  ;;  %v1990_v51 = vmul.f32 %v5224_v48, %v5224_v48  ;;  %v3826_v28 = vld [vmem:[%s4918_s10 + $0xa0] sm:$0xff]  }
 0xef3   : > { %1993 = vadd.xlane.f32.xlu0 %v1990_v51  ;;  %v3827_v51 = vld [vmem:[%s4918_s10 + $0x68] sm:$0xff]  }
 0xf7c   : > { %v1992_v8 = vpop.xlane.xlu0 %1991 }
 0xf7d   : > { %v1995_v9 = vmul.f32 0.0078125, %v1992_v8 }
 0xf7f   : > { %v1997_v10 = vadd.f32 1e-05, %v1995_v9 }
 0xf80   : > { %v1994_v11 = vpop.xlane.xlu0 %1993 }
 0xf81   : > { %3885 = vrsqrt.f32 %v1997_v10  ;;  %v1996_v50 = vmul.f32 0.0078125, %v1994_v11 }
 0xf83   : > { %v1998_v13 = vadd.f32 1e-05, %v1996_v50 }
 0xf85   : > { %3887 = vrsqrt.f32 %v1998_v13 }
 0xf8b   : > { %v3886_v20 = vpop.eup %3885 }
 0xf8c   : > { %v2001_v14 = vmul.f32 %v3886_v20, %v5221_v16  ;;  %v3823_v16 = vld [vmem:[%s4918_s10 + $0x60] sm:$0xff]  }
 0xf8e   : > { %v2009_v23 = vmul.f32 %v3247_v17, %v2001_v14 }
 0xf8f   : > { %v3888_v18 = vpop.eup %3887 }
 0xf90   : > { %v2002_v19 = vmul.f32 %v3888_v18, %v5224_v48  ;;  %v2017_v25 = vadd.f32 %v3248_v24, %v2009_v23  ;;  %v3825_v48 = vld [vmem:[%s4918_s10 + $0x20] sm:$0xff]  }
 0xf92   : > { %v2010_v63 = vmul.f32 %v3247_v17, %v2002_v19 }
 0xf94   : > { %v2018_v62 = vadd.f32 %v3248_v24, %v2010_v63 }
 0xf96   : > { %v2019_v26 = vpack.c.bf16 %v2018_v62, %v2017_v25 }
 0xf98   : > { %2245 = vmatmul.mubr.bf16.vlgmr.msra.gmra.mrb[24].mxu0 %v2019_v26  ;;  %2288 = vmatmul.mubr.bf16.vlgmr.msra.gmra.mrb[28].mxu1 %v2019_v26 }
 0xf99   : > { %3385 = vmatpush3.bf16.msra.mxu0 %v3809_v34  ;;  %3407 = vmatpush3.bf16.msra.mxu1 %v3810_v35 }
 0xf9a   : > { %3386 = vmatprep.subr.bf16.mxu0 %v3811_v38  ;;  %3408 = vmatprep.subr.bf16.mxu1 %v3812_v7 }
 0xf9d   : > { %3387 = vmatpush3.bf16.msra.mxu0 %v3813_v40  ;;  %3409 = vmatpush3.bf16.msra.mxu1 %v3814_v41 }
 0xf9e   : > { %3388 = vmatprep.subr.bf16.mxu0 %v3815_v43  ;;  %3410 = vmatprep.subr.bf16.mxu1 %v3816_v44 }
 0xfa1   : > { %3389 = vmatpush3.bf16.msra.mxu0 %v3817_v45  ;;  %3411 = vmatpush3.bf16.msra.mxu1 %v3818_v21 }
 0xfa2   : > { %3390 = vmatprep.subr.bf16.mxu0 %v3819_v46  ;;  %3412 = vmatprep.subr.bf16.mxu1 %v3820_v47 }
 0xfa5   : > { %3391 = vmatpush3.bf16.msra.mxu0 %v3821_v49  ;;  %3413 = vmatpush3.bf16.msra.mxu1 %v3822_v52 }
 0xfa6   : > { %3392 = vmatprep.subr.bf16.mxu0 %v3823_v16  ;;  %3414 = vmatprep.subr.bf16.mxu1 %v3824_v27 }
 0xfa9   : > { %3393 = vmatpush3.bf16.msra.mxu0 %v3825_v48  ;;  %3415 = vmatpush3.bf16.msra.mxu1 %v3826_v28 }
 0xfaa   : > { %3394 = vmatprep.subr.bf16.mxu0 %v3827_v51  ;;  %3416 = vmatprep.subr.bf16.mxu1 %v3828_v53 }
 0xfad   : > { %3395 = vmatpush3.bf16.msra.mxu0 %v3829_v22  ;;  %3417 = vmatpush3.bf16.msra.mxu1 %v3830_v29 }
 0xfae   : > { %3396 = vmatprep.subr.bf16.mxu0 %v3831_v4  ;;  %3418 = vmatprep.subr.bf16.mxu1 %v3832_v54 }
 0xfb1   : > { %3397 = vmatpush3.bf16.msra.mxu0 %v3833_v55  ;;  %3419 = vmatpush3.bf16.msra.mxu1 %v3834_v56 }
 0xfb2   : > { %3398 = vmatprep.subr.bf16.mxu0 %v3835_v57  ;;  %3420 = vmatprep.subr.bf16.mxu1 %v3836_v58 }
 0xfb5   : > { %3399 = vmatpush3.bf16.msra.mxu0 %v3837_v59  ;;  %3421 = vmatpush3.bf16.msra.mxu1 %v3838_v30 }
0x106b   : > { %v2246_v60 = vpop.f32.mrb[24].mxu0  ;;  %v5292_v61 = vpop.f32.mrb[28].mxu1 }
0x106c   : > { %v5294_v37 = vmul.f32 0.70710677, %v2246_v60  ;;  %v5297_v42 = vmul.f32 0.70710677, %v5292_v61  ;;  %v5299_v36 = vpop.f32.mrb[25].mxu0  ;;  %v5301_v2 = vpop.f32.mrb[29].mxu1 }
0x106d   : > { %v5306_v15 = vmul.f32 0.70710677, %v5299_v36  ;;  %v5308_v1 = vpop.f32.mrb[26].mxu0  ;;  %v5312_v8 = vmul.f32 0.70710677, %v5301_v2  ;;  %v5314_v11 = vpop.f32.mrb[30].mxu1 }
0x106e   : > { %v2330_v0 = vand.u32 2147483647, %v5294_v37  ;;  %v2332_v12 = vand.u32 2147483647, %v5297_v42  ;;  %v5316_v50 = vpop.f32.mrb[27].mxu0  ;;  %v5318_v20 = vpop.f32.mrb[31].mxu1 }
0x106f   : > { %v2331_v6 = vand.u32 2147483647, %v5306_v15  ;;  %v2333_v17 = vand.u32 2147483647, %v5312_v8  ;;  %v5322_v18 = vmul.f32 0.70710677, %v5308_v1 }
0x1070   : > { %v2338_v3 = vmul.f32 0.3275911, %v2330_v0  ;;  %v2340_v5 = vmul.f32 0.3275911, %v2332_v12  ;;  %v2442_v19 = vsub.f32 0.0, %v2330_v0  ;;  %v2444_v24 = vsub.f32 0.0, %v2332_v12 }
0x1071   : > { %v2339_v13 = vmul.f32 0.3275911, %v2331_v6  ;;  %v2341_v23 = vmul.f32 0.3275911, %v2333_v17  ;;  %v2334_v63 = vand.u32 2147483647, %v5322_v18 }
0x1072   : > { %v2346_v9 = vadd.f32 1.0, %v2338_v3  ;;  %v2348_v10 = vadd.f32 1.0, %v2340_v5  ;;  %v5326_v25 = vmul.f32 0.70710677, %v5314_v11  ;;  %v2450_v32 = vmul.f32 %v2442_v19, %v2330_v0 }
0x1073   : > { %v2347_v14 = vadd.f32 1.0, %v2339_v13  ;;  %v2349_v62 = vadd.f32 1.0, %v2341_v23  ;;  %v2342_v26 = vmul.f32 0.3275911, %v2334_v63  ;;  %v2452_v34 = vmul.f32 %v2444_v24, %v2332_v12 }
0x1074   : > { %3889 = vrcp.f32 %v2346_v9  ;;  %v2336_v31 = vand.u32 2147483647, %v5326_v25  ;;  %v2443_v35 = vsub.f32 0.0, %v2331_v6  ;;  %v5330_v40 = vmul.f32 0.70710677, %v5316_v50 }
0x1075   : > { %3891 = vrcp.f32 %v2348_v10  ;;  %v2350_v38 = vadd.f32 1.0, %v2342_v26  ;;  %v5335_v44 = vmul.f32 0.70710677, %v5318_v20  ;;  %v2458_v46 = vmul.f32 1.442695, %v2450_v32 }
0x1076   : > { %3893 = vrcp.f32 %v2347_v14  ;;  %v2344_v7 = vmul.f32 0.3275911, %v2336_v31  ;;  %v5341_v47 = vand.u32 2147483647, %v5330_v40  ;;  %v2462_v52 = vmul.f32 1.442695, %v2452_v34 }
0x1077   : > { %3895 = vrcp.f32 %v2349_v62  ;;  %v2451_v16 = vmul.f32 %v2443_v35, %v2331_v6  ;;  %v2445_v48 = vsub.f32 0.0, %v2333_v17  ;;  %v5347_v53 = vmul.f32 0.5, %v2246_v60 }
0x1078   : > { %3897 = vrcp.f32 %v2350_v38  ;;  %v2352_v43 = vadd.f32 1.0, %v2344_v7  ;;  %v2343_v28 = vmul.f32 0.3275911, %v5341_v47  ;;  %v2446_v29 = vsub.f32 0.0, %v2334_v63 }
0x1079   : > { %v5350_v4 = vand.u32 2147483647, %v5335_v44  ;;  %v2460_v58 = vmul.f32 1.442695, %v2451_v16  ;;  %v2448_v59 = vsub.f32 0.0, %v2336_v31  ;;  %v2453_v3 = vmul.f32 %v2445_v48, %v2333_v17 }
0x107a   : > { %3899 = vrcp.f32 %v2352_v43  ;;  %v2351_v56 = vadd.f32 1.0, %v2343_v28  ;;  %v2454_v9 = vmul.f32 %v2446_v29, %v2334_v63  ;;  %v5361_v14 = vmul.f32 0.5, %v5292_v61 }
0x107b   : > { %3901 = vpow2.f32 %v2458_v46  ;;  %v2345_v30 = vmul.f32 0.3275911, %v5350_v4  ;;  %v2456_v17 = vmul.f32 %v2448_v59, %v2336_v31  ;;  %vm2314_vm6 = vcmp.ge.f32.partialorder %v5294_v37, 0.0 }
0x107c   : > { %3903 = vrcp.f32 %v2351_v56  ;;  %v2464_v35 = vmul.f32 1.442695, %v2453_v3  ;;  %v2466_v38 = vmul.f32 1.442695, %v2454_v9  ;;  %v2447_v46 = vsub.f32 0.0, %v5341_v47 }
0x107d   : > { %v2353_v10 = vadd.f32 1.0, %v2345_v30  ;;  %3905 = vpow2.f32 %v2462_v52  ;;  %vm2316_vm7 = vcmp.ge.f32.partialorder %v5297_v42, 0.0  ;;  %vm2315_vm8 = vcmp.ge.f32.partialorder %v5306_v15, 0.0 }
0x107e   : > { %v5332_v41 = vpop.eup %3889  ;;  %vm2318_vm9 = vcmp.ge.f32.partialorder %v5322_v18, 0.0  ;;  %vm2320_vm10 = vcmp.ge.f32.partialorder %v5326_v25, 0.0  ;;  %vm2317_vm11 = vcmp.ge.f32.partialorder %v5312_v8, 0.0  ;;  %vm2319_vm12 = vcmp.ge.f32.partialorder %v5330_v40, 0.0 }
0x107f   : > { %v5337_v45 = vpop.eup %3891  ;;  %v2370_v21 = vmul.f32 1.0614054, %v5332_v41  ;;  %3907 = vrcp.f32 %v2353_v10  ;;  %vm2321_vm13 = vcmp.ge.f32.partialorder %v5335_v44, 0.0 }
0x1080   : > { %v2372_v49 = vmul.f32 1.0614054, %v5337_v45  ;;  %v5345_v51 = vpop.eup %3893  ;;  %3909 = vpow2.f32 %v2460_v58 }
0x1081   : > { %v2378_v27 = vadd.f32 -1.4531521, %v2370_v21  ;;  %v2371_v55 = vmul.f32 1.0614054, %v5345_v51  ;;  %v5356_v0 = vpop.eup %3895  ;;  %3911 = vpow2.f32 %v2464_v35  ;;  %v4352_v35 = vmov -1.0  }
0x1082   : > { %v2380_v22 = vadd.f32 -1.4531521, %v2372_v49  ;;  %v2373_v6 = vmul.f32 1.0614054, %v5356_v0  ;;  %v5364_v23 = vpop.eup %3897  ;;  %3913 = vpow2.f32 %v2466_v38  ;;  %v2329_v44 = vsel %vm2321_vm13, 1.0, %v4352_v35 }
0x1083   : > { %v2386_v54 = vmul.f32 %v5332_v41, %v2378_v27  ;;  %v2379_v12 = vadd.f32 -1.4531521, %v2371_v55  ;;  %v2374_v32 = vmul.f32 1.0614054, %v5364_v23  ;;  %v2470_v27 = vmul.f32 1.442695, %v2456_v17 }
0x1084   : > { %v2388_v57 = vmul.f32 %v5337_v45, %v2380_v22  ;;  %v2381_v62 = vadd.f32 -1.4531521, %v2373_v6  ;;  %v5370_v7 = vpop.eup %3899 }
0x1085   : > { %v2394_v60 = vadd.f32 1.4214138, %v2386_v54  ;;  %v2387_v19 = vmul.f32 %v5345_v51, %v2379_v12  ;;  %v2382_v31 = vadd.f32 -1.4531521, %v2374_v32  ;;  %v2376_v16 = vmul.f32 1.0614054, %v5370_v7  ;;  %v3902_v48 = vpop.eup %3901 }
0x1086   : > { %v2396_v5 = vadd.f32 1.4214138, %v2388_v57  ;;  %v2389_v61 = vmul.f32 %v5356_v0, %v2381_v62  ;;  %v2449_v54 = vsub.f32 0.0, %v5350_v4  ;;  %v5380_v58 = vpop.eup %3903  ;;  %v2455_v12 = vmul.f32 %v2447_v46, %v5341_v47 }
0x1087   : > { %v2402_v13 = vmul.f32 %v5332_v41, %v2394_v60  ;;  %v2395_v63 = vadd.f32 1.4214138, %v2387_v19  ;;  %v2390_v29 = vmul.f32 %v5364_v23, %v2382_v31  ;;  %v2384_v57 = vadd.f32 -1.4531521, %v2376_v16  ;;  %v3906_v9 = vpop.eup %3905 }
0x1088   : > { %v2404_v24 = vmul.f32 %v5337_v45, %v2396_v5  ;;  %v2397_v52 = vadd.f32 1.4214138, %v2389_v61  ;;  %v2375_v6 = vmul.f32 1.0614054, %v5380_v58  ;;  %3915 = vpow2.f32 %v2470_v27 }
0x1089   : > { %v2410_v26 = vadd.f32 -0.28449672, %v2402_v13  ;;  %v2403_v21 = vmul.f32 %v5345_v51, %v2395_v63  ;;  %v2398_v60 = vadd.f32 1.4214138, %v2390_v29  ;;  %v2392_v5 = vmul.f32 %v5370_v7, %v2384_v57 }
0x108a   : > { %v2412_v34 = vadd.f32 -0.28449672, %v2404_v24  ;;  %v2405_v56 = vmul.f32 %v5356_v0, %v2397_v52  ;;  %v2457_v19 = vmul.f32 %v2449_v54, %v5350_v4  ;;  %v2383_v17 = vadd.f32 -1.4531521, %v2375_v6 }
0x108b   : > { %v2418_v43 = vmul.f32 %v5332_v41, %v2410_v26  ;;  %v2411_v22 = vadd.f32 -0.28449672, %v2403_v21  ;;  %v2406_v13 = vmul.f32 %v5364_v23, %v2398_v60  ;;  %v2400_v47 = vadd.f32 1.4214138, %v2392_v5 }
0x108c   : > { %v2420_v49 = vmul.f32 %v5337_v45, %v2412_v34  ;;  %v2413_v3 = vadd.f32 -0.28449672, %v2405_v56  ;;  %v2468_v34 = vmul.f32 1.442695, %v2455_v12  ;;  %v2391_v38 = vmul.f32 %v5380_v58, %v2383_v17 }
0x108d   : > { %v2426_v28 = vadd.f32 0.2548296, %v2418_v43  ;;  %v2419_v30 = vmul.f32 %v5345_v51, %v2411_v22  ;;  %v2414_v32 = vadd.f32 -0.28449672, %v2406_v13  ;;  %v2408_v4 = vmul.f32 %v5370_v7, %v2400_v47 }
0x108e   : > { %v2428_v55 = vadd.f32 0.2548296, %v2420_v49  ;;  %v2421_v62 = vmul.f32 %v5356_v0, %v2413_v3  ;;  %v2472_v46 = vmul.f32 1.442695, %v2457_v19  ;;  %v2399_v27 = vadd.f32 1.4214138, %v2391_v38 }
0x108f   : > { %v2434_v59 = vmul.f32 %v5332_v41, %v2426_v28  ;;  %v5390_v41 = vpop.eup %3907  ;;  %v2427_v24 = vadd.f32 0.2548296, %v2419_v30  ;;  %v2422_v21 = vmul.f32 %v5364_v23, %v2414_v32  ;;  %v2416_v16 = vadd.f32 -0.28449672, %v2408_v4 }
0x1090   : > { %v2436_v10 = vmul.f32 %v5337_v45, %v2428_v55  ;;  %v3910_v26 = vpop.eup %3909  ;;  %v2377_v61 = vmul.f32 1.0614054, %v5390_v41  ;;  %v2322_v45 = vsel %vm2314_vm6, 1.0, %v4352_v35  ;;  %v2429_v43 = vadd.f32 0.2548296, %v2421_v62 }
0x1091   : > { %v2474_v63 = vmul.f32 %v3902_v48, %v2434_v59  ;;  %v2435_v52 = vmul.f32 %v5345_v51, %v2427_v24  ;;  %v2430_v28 = vadd.f32 0.2548296, %v2422_v21  ;;  %3917 = vpow2.f32 %v2468_v34  ;;  %v3912_v22 = vpop.eup %3911 }
0x1092   : > { %v2385_v31 = vadd.f32 -1.4531521, %v2377_v61  ;;  %v2476_v49 = vmul.f32 %v3906_v9, %v2436_v10  ;;  %v2424_v29 = vmul.f32 %v5370_v7, %v2416_v16  ;;  %v2407_v54 = vmul.f32 %v5380_v58, %v2399_v27  ;;  %v3914_v57 = vpop.eup %3913 }
0x1093   : > { %v2482_v48 = vsub.f32 1.0, %v2474_v63  ;;  %v2437_v55 = vmul.f32 %v5356_v0, %v2429_v43  ;;  %v2438_v51 = vmul.f32 %v5364_v23, %v2430_v28  ;;  %3919 = vpow2.f32 %v2472_v46  ;;  %v3916_v3 = vpop.eup %3915 }
0x1094   : > { %v2393_v37 = vmul.f32 %v5390_v41, %v2385_v31  ;;  %v2484_v59 = vsub.f32 1.0, %v2476_v49  ;;  %v2475_v30 = vmul.f32 %v3910_v26, %v2435_v52  ;;  %v2432_v60 = vadd.f32 0.2548296, %v2424_v29 }
0x1095   : > { %v2415_v12 = vadd.f32 -0.28449672, %v2407_v54  ;;  %v2490_v5 = vmul.f32 %v2482_v48, %v2322_v45  ;;  %v2324_v6 = vsel %vm2316_vm7, 1.0, %v4352_v35  ;;  %v2478_v9 = vmul.f32 %v3914_v57, %v2438_v51 }
0x1096   : > { %v2401_v56 = vadd.f32 1.4214138, %v2393_v37  ;;  %v2323_v0 = vsel %vm2315_vm8, 1.0, %v4352_v35  ;;  %v2326_v23 = vsel %vm2318_vm9, 1.0, %v4352_v35  ;;  %v2440_v13 = vmul.f32 %v5370_v7, %v2432_v60 }
0x1097   : > { %v2423_v19 = vmul.f32 %v5380_v58, %v2415_v12  ;;  %v2477_v24 = vmul.f32 %v3912_v22, %v2437_v55  ;;  %v2486_v62 = vsub.f32 1.0, %v2478_v9  ;;  %v2492_v47 = vmul.f32 %v2484_v59, %v2324_v6 }
0x1098   : > { %v2409_v10 = vmul.f32 %v5390_v41, %v2401_v56  ;;  %v2483_v17 = vsub.f32 1.0, %v2475_v30  ;;  %v2480_v26 = vmul.f32 %v3916_v3, %v2440_v13  ;;  %v2498_v32 = vadd.f32 1.0, %v2490_v5 }
0x1099   : > { %v2431_v63 = vadd.f32 0.2548296, %v2423_v19  ;;  %v2494_v15 = vmul.f32 %v2486_v62, %v2326_v23  ;;  %v2302_v34 = vmul.f32 0.5, %v5308_v1  ;;  %v2328_v7 = vsel %vm2320_vm10, 1.0, %v4352_v35 }
0x109a   : > { %v2417_v42 = vadd.f32 -0.28449672, %v2409_v10  ;;  %v2488_v61 = vsub.f32 1.0, %v2480_v26  ;;  %v2485_v25 = vsub.f32 1.0, %v2477_v24  ;;  %v2500_v21 = vadd.f32 1.0, %v2492_v47 }
0x109b   : > { %v2439_v45 = vmul.f32 %v5380_v58, %v2431_v63  ;;  %v3918_v4 = vpop.eup %3917  ;;  %v2502_v38 = vadd.f32 1.0, %v2494_v15  ;;  %v2491_v31 = vmul.f32 %v2483_v17, %v2323_v0  ;;  %v2506_v16 = vmul.f32 %v2498_v32, %v5347_v53 }
0x109c   : > { %v2425_v18 = vmul.f32 %v5390_v41, %v2417_v42  ;;  %v2496_v46 = vmul.f32 %v2488_v61, %v2328_v7  ;;  %v2325_v1 = vsel %vm2317_vm11, 1.0, %v4352_v35  ;;  %v2304_v48 = vmul.f32 0.5, %v5314_v11 }
0x109d   : > { %v2479_v49 = vmul.f32 %v3918_v4, %v2439_v45  ;;  %v3920_v52 = vpop.eup %3919  ;;  %v2510_v27 = vmul.f32 %v2502_v38, %v2302_v34  ;;  %v2493_v22 = vmul.f32 %v2485_v25, %v2325_v1  ;;  %v2327_v54 = vsel %vm2319_vm12, 1.0, %v4352_v35 }
0x109e   : > { %v2433_v43 = vadd.f32 0.2548296, %v2425_v18  ;;  %v2504_v28 = vadd.f32 1.0, %v2496_v46  ;;  %v2508_v55 = vmul.f32 %v2500_v21, %v5361_v14  ;;  %v2499_v8 = vadd.f32 1.0, %v2491_v31 }
0x109f   : > { %v2487_v37 = vsub.f32 1.0, %v2479_v49  ;;  %v2514_v29 = vpack.c.bf16 %v2510_v27, %v2506_v16  ;;  %v2303_v59 = vmul.f32 0.5, %v5316_v50  ;;  %v2501_v60 = vadd.f32 1.0, %v2493_v22 }
0x10a0   : > { %v2441_v58 = vmul.f32 %v5390_v41, %v2433_v43  ;;  %v2512_v51 = vmul.f32 %v2504_v28, %v2304_v48  ;;  %v2299_v41 = vmul.f32 0.5, %v5299_v36  ;;  %v2301_v5 = vmul.f32 0.5, %v5301_v2 }
0x10a1   : > { %v2495_v56 = vmul.f32 %v2487_v37, %v2327_v54  ;;  %v2305_v14 = vmul.f32 0.5, %v5318_v20 }
0x10a2   : > { %v2481_v53 = vmul.f32 %v3920_v52, %v2441_v58  ;;  %v2516_v11 = vpack.c.bf16 %v2512_v51, %v2508_v55  ;;  %v2507_v3 = vmul.f32 %v2499_v8, %v2299_v41  ;;  %v2509_v10 = vmul.f32 %v2501_v60, %v2301_v5 }
0x10a3   : > { %v2503_v30 = vadd.f32 1.0, %v2495_v56 }
0x10a4   : > { %v2489_v57 = vsub.f32 1.0, %v2481_v53 }
0x10a5   : > { %v2511_v40 = vmul.f32 %v2503_v30, %v2303_v59 }
0x10a6   : > { %v2497_v12 = vmul.f32 %v2489_v57, %v2329_v44 }
0x10a7   : > { %v2515_v9 = vpack.c.bf16 %v2511_v40, %v2507_v3 }
0x10a8   : > { %v2505_v6 = vadd.f32 1.0, %v2497_v12 }
0x10a9   : > { %2806 = vmatprep.mubr.bf16.mxu0 %v2515_v9 }
0x10aa   : > { %v2513_v0 = vmul.f32 %v2505_v6, %v2305_v14  ;;  %2807 = vmatmul.mubr.bf16.vlgmr.msra.gmra.mrb[28].mxu0 %v2514_v29 }
0x10ac   : > { %v2517_v36 = vpack.c.bf16 %v2513_v0, %v2509_v10 }
0x10ae   : > { %2847 = vmatprep.mubr.bf16.mxu1 %v2517_v36 }
0x10af   : > { %2848 = vmatmul.mubr.bf16.vlgmr.msra.gmra.mrb[32].mxu1 %v2516_v11 }
0x117d   : > { %v3400_v50 = vpop.f32.mrb[28].mxu0 }
0x117e   : > { %v3401_v35 = vpop.f32.mrb[29].mxu0 }
0x117f   : > { %v3402_v23 = vadd.f32 %v3401_v35, %v3400_v50  ;;  %v3403_v13 = vpop.f32.mrb[30].mxu0 }
0x1180   : > { %v3404_v2 = vpop.f32.mrb[31].mxu0 }
0x1181   : > { %v3405_v24 = vadd.f32 %v3404_v2, %v3403_v13 }
0x1182   : > { %v3422_v19 = vpop.f32.mrb[32].mxu1 }
0x1183   : > { %v3423_v20 = vpop.f32.mrb[33].mxu1 }
0x1184   : > { %v3424_v62 = vadd.f32 %v3423_v20, %v3422_v19  ;;  %v3425_v42 = vpop.f32.mrb[34].mxu1 }
0x1185   : > { %v3426_v47 = vpop.f32.mrb[35].mxu1 }
0x1186   : > { %v2850_v17 = vadd.f32 %v3424_v62, %v3402_v23  ;;  %v3427_v26 = vadd.f32 %v3426_v47, %v3425_v42 }
0x1188   : > { %v2856_v63 = vadd.f32 %v2850_v17, %v5205_v33  ;;  %v2853_v32 = vadd.f32 %v3427_v26, %v3405_v24 }
0x118a   : > { %2858 = vst [vmem:[%s4920_s22] sm:$0xff] %v2856_v63  ;;  %v2857_v15 = vadd.f32 %v2853_v32, %v5208_v39 }
0x118c   : > { %2859 = vst [vmem:[%s4920_s22 + $0x8] sm:$0xff] %v2857_v15 }
0x118d   : > { %4206 = shalt.err (!%p4203_p9)
}
0x118e   : > { %s4207_s10 = scalar_lea.hbm %s5450_s2, 256  ;;  %s4211_s6 = scalar_lea.hbm %s5650_s26, 512 }
0x118f   : > { %p4208_p6 = scmp.ne.s32.totalorder %s5450_s2, %s4207_s10  ;;  %p4212_p8 = scmp.lt.u32.totalorder %s5450_s2, %s5650_s26 }
0x1190   : > { %p4213_p10 = scmp.lt.u32.totalorder %s4211_s6, %s4207_s10  ;;  %p4215_p4 = scmp.lt.u32.totalorder %s4207_s10, %s5450_s2 }
0x1191   : > { %p4209_p7 = pnand %p4208_p6, %p5652_p5 }
0x1192   : > { %p4214_p2 = por %p4213_p10, %p4212_p8 }
0x1193   : > { %p4210_p12 = pneg %p4209_p7 }
0x1194   : > { %p4216_p11 = por %p4215_p4, %p4214_p2 }
0x1196   : > { %p4217_p3 = pnand %p4216_p11, %p4210_p12 }
0x1198   : > { %4220 = shalt.err (!%p4217_p3)
}
0x1199   : > { %s4354_s17 = smov 128   ;;  %s4355_s21 = smov 8  }
0x119a   : > { %3567 = dma.vmem_to_hbm [thread:$0]  (%p5652_p5), %s5452_s14, 256, %s5450_s2, %s5459_s3, %s4354_s17, %s4354_s17, %s4355_s21  }
0x119b PF: > { %s5653_s0 = sld [smem:[#allocation33_spill]]  ;;  %s5654_s15 = sld [smem:[#allocation24_spill]] }
0x119c   : > { %s5655_s8 = sld [smem:[#allocation40_spill]] }
0x11a1   : > { %p3602_p0 = scmp.ge.s32.totalorder %s5653_s0, 2  ;;  %s2889_s20 = sand.u32 1, %s5654_s15  }
0x11a2   : > { %p5656_p13 = scmp.ne.s32.totalorder %s5655_s8, 0  ;;  %s2890_s5 = scalar_lea.sflag [#allocation4], %s2889_s20 }
0x11a4   : > { %p3598_p1 = pnand %p3602_p0, %p5656_p13 }
0x11a6   : > { %4286 = dma.done.wait (!%p3598_p1), %s2890_s5, 256  }
0x11a7   : > { %4288 = vsyncadd (!%p3598_p1), %s2890_s5, 4294967040  ;;  %s42_s23 = sadd.s32 1, %s5653_s0   ;;  %s5657_s29 = sld [smem:[#allocation25_spill]] }
0x11a8   : > { %p39_p9 = scmp.ge.s32.totalorder %s42_s23, 6   ;;  %s5658_s30 = sld [smem:[#allocation26_spill]] }
0x11a9   : > { %s5659_s15 = sld [smem:[#allocation38_spill]]  ;;  %s5660_s16 = sld [smem:[#allocation27_spill]] }
0x11aa   : > { %s5661_s17 = sld [smem:[#allocation28_spill]]  ;;  %s5662_s18 = sld [smem:[#allocation37_spill]] }
0x11ab   : > { %s5663_s19 = sld [smem:[#allocation31_spill]]  ;;  %s5664_s20 = sld [smem:[#allocation32_spill]] }
0x11ac   : > { %s5665_s21 = sld [smem:[#allocation35_spill]]  ;;  %s5666_s22 = sld [smem:[#allocation36_spill]] }
0x11ad   :  { %41 = sbr.rel (!%p39_p9) target bundleno = 33 (0x21), region = 236 }
0x11b4   :  { %2895 = vsyncpa [#allocation3], 1 }
0x11b5   :  { %2897 = vsyncpa [#allocation3 + $0x1], 1 }
0x11b6   :  { %2898 = vsyncpa [#allocation6], 1 }
0x11b7   :  { %2900 = vsyncpa [#allocation6 + $0x1], 1 }
0x11b8   :  { %2901 = vsyncpa [#allocation9], 1 }
0x11b9   :  { %2903 = vsyncpa [#allocation9 + $0x1], 1 }
0x11ba   :  { %2904 = vsyncpa [#allocation12], 1 }
0x11bb   :  { %2906 = vsyncpa [#allocation12 + $0x1], 1 }
0x11bc   :  { %2907 = vsyncpa [#allocation15], 1 }
0x11bd   :  { %2909 = vsyncpa [#allocation15 + $0x1], 1 }
0x11be   :  { %2910 = vsyncpa [#allocation4], 1 }
0x11bf   :  { %2912 = vsyncpa [#allocation4 + $0x1], 1 }

</bundles_post_ra>
